<compile_context>
chip_gen: v7x
topology: tpu7x:2x2x1
jax: 0.10.0
libtpu: 0.0.40
codegen_flags: <defaults>
</compile_context>

<pallas_src>
import functools

import jax
import jax.numpy as jnp
from jax import lax
from jax.experimental import pallas as pl
from jax.experimental.pallas import tpu as pltpu


# ---------------------------------------------------------------------------
# Helpers: generation-aware tiling
# ---------------------------------------------------------------------------
def _round_up(x, m):
    return -(-x // m) * m


def _vmem_capacity_bytes():
    try:
        info = pltpu.get_tpu_info()
        for attr in ("vmem_capacity_bytes", "vmem_bytes", "vmem_size_bytes"):
            v = getattr(info, attr, None)
            if v:
                return int(v)
    except Exception:
        pass
    return 64 * 1024 * 1024          # conservative default (v7x-sized)


def _pick_tiles(C, HW, itemsize, *, max_c_tile=None):
    """Pick (c_tile, chunk, vmem_limit_bytes) using the PADDED VMEM footprint.

    The (1, c_tile, HW) input block really occupies
        roundup(c_tile, 32/itemsize) * roundup(HW, 128) * itemsize
    bytes and is double-buffered by the pipeline, so budgeting with raw sizes can
    blow v7x's 64 MiB VMEM while passing on v5e/v6e (review correctness concern).
    """
    lanes = _round_up(HW, 128)
    sub = max(1, 32 // itemsize)                       # 8 for f32, 16 bf16, 32 int8

    def blk_bytes(ct):
        return _round_up(ct, sub) * lanes * itemsize

    cap = _vmem_capacity_bytes()
    vmem_limit = min((cap * 3) // 4, 100 * 1024 * 1024)   # ~48 MiB v7x, ~96 MiB v5e/v6e
    # Reserve: double-buffered (1,2,HW) f32 stats block + two (1,HW) f32 scratch rows.
    reserve = 2 * 8 * lanes * 4 + 2 * 8 * lanes * 4 + (2 << 20)
    per_block = max((vmem_limit - reserve) // 2, 1 << 20)  # input is double-buffered

    # c_tile must divide C and be sublane-aligned (or equal C) for legal BlockSpecs.
    cands = sorted({d for d in range(sub, C + 1, sub) if C % d == 0} | {C}, reverse=True)
    if max_c_tile is not None:
        capped = [d for d in cands if d <= max_c_tile]
        cands = capped or [cands[-1]]
    c_tile = next((d for d in cands if blk_bytes(d) <= per_block), cands[-1])

    # In-kernel chunk: bound each loaded value to ~64 vregs so the reduce never spills.
    chunk_budget = 64 * 4096
    ccands = sorted({d for d in range(sub, c_tile + 1, sub) if c_tile % d == 0} | {c_tile},
                    reverse=True)
    chunk = next((d for d in ccands if d * lanes * 4 <= chunk_budget), ccands[-1])

    vmem_limit = max(vmem_limit, 2 * blk_bytes(c_tile) + reserve)
    return c_tile, chunk, vmem_limit


# ---------------------------------------------------------------------------
# Pass 1: lane-dense channel sum / max  ->  (N, 2, H*W) f32
# ---------------------------------------------------------------------------
def _channel_stats_kernel(x_ref, o_ref, sum_s, max_s, *, chunk, n_chunks):
    """x_ref: (1, c_tile, HW) block of the flat view; o_ref: (1, 2, HW) f32 stats.

    sum_s / max_s: (1, HW) f32 VMEM scratch, resident across the channel grid axis.
    """
    k = pl.program_id(1)

    @pl.when(k == 0)
    def _init():
        sum_s[...] = jnp.zeros(sum_s.shape, sum_s.dtype)
        max_s[...] = jnp.full(max_s.shape, -jnp.inf, max_s.dtype)

    def accum(c0):
        # One SSA load per chunk feeds BOTH reductions (single pass over the tile).
        xc = x_ref[0, pl.ds(c0, chunk), :].astype(jnp.float32)      # (chunk, HW)
        sum_s[...] = sum_s[...] + jnp.sum(xc, axis=0, keepdims=True)
        max_s[...] = jnp.maximum(max_s[...], jnp.max(xc, axis=0, keepdims=True))

    if n_chunks <= 8:                           # short: fully unrolled static loop
        for t in range(n_chunks):
            accum(t * chunk)
    else:                                       # long: scf.for with aligned slices
        @pl.loop(0, n_chunks)
        def _chunk_loop(t):
            accum(pl.multiple_of(t * chunk, chunk))

    @pl.when(k == pl.num_programs(1) - 1)
    def _store():
        o_ref[0, 0:1, :] = sum_s[...]           # raw channel sum (1/C folded into bands)
        o_ref[0, 1:2, :] = max_s[...]


# ---------------------------------------------------------------------------
# Pass 2: 7x7 (2->1) conv as banded matmuls + sigmoid  ->  (N, 1, H, W)
# ---------------------------------------------------------------------------
def _conv_sigmoid_kernel(s_ref, a_ref, g_ref, o_ref, *, ksize):
    """s_ref: (1, 2, H, W) stats; a_ref: (K, H, H); g_ref: (2, K, W, W); o_ref: (1,1,H,W)."""
    s_sum = s_ref[0, 0].astype(jnp.float32)     # (H, W) raw channel sum
    s_max = s_ref[0, 1].astype(jnp.float32)     # (H, W) channel max

    acc = jnp.zeros(s_sum.shape, jnp.float32)
    for i in range(ksize):                      # 7 row offsets, statically unrolled
        t = (jnp.dot(s_sum, g_ref[0, i], precision=lax.Precision.HIGHEST,
                     preferred_element_type=jnp.float32)
             + jnp.dot(s_max, g_ref[1, i], precision=lax.Precision.HIGHEST,
                       preferred_element_type=jnp.float32))
        acc = acc + jnp.dot(a_ref[i], t, precision=lax.Precision.HIGHEST,
                            preferred_element_type=jnp.float32)

    o_ref[0, 0] = jax.nn.sigmoid(acc).astype(o_ref.dtype)


def _conv_band_matrices(weight, H, W, C):
    """Build row-shift selectors A and column band matrices G in the wrapper.

    out = sum_i A_i @ (S_sum @ G[0, i] + S_max @ G[1, i]) reproduces conv2d(pad=K//2)
    with zero padding baked into the bands; 1/C of the mean is folded into G[0].
    """
    _, _, K, _ = weight.shape
    p = K // 2
    w2 = weight[0].astype(jnp.float32)                      # (2, K, K)

    r = jnp.arange(H)
    i = jnp.arange(K)
    # A[i, r, r'] = 1 iff r' == r + i - p  (out-of-range rows -> 0, i.e. zero padding)
    A = (r[None, None, :] == r[None, :, None] + i[:, None, None] - p).astype(jnp.float32)

    c1 = jnp.arange(W)[:, None]
    c0 = jnp.arange(W)[None, :]
    j = c1 - c0 + p
    valid = ((j >= 0) & (j < K)).astype(jnp.float32)        # (W, W) band mask
    G = w2[:, :, jnp.clip(j, 0, K - 1)] * valid[None, None]  # (2, K, W, W)
    G = G.at[0].multiply(1.0 / C)          # fold mean's 1/C: pass 1 emits the raw sum
    return A, G


# ---------------------------------------------------------------------------
# Wrapper
# ---------------------------------------------------------------------------
def spatial_attention(x, weight, *, max_c_tile=None):
    """SpatialAttention forward.

    x      : (N, C, H, W)   NCHW activations (any float dtype; compute in f32)
    weight : (1, 2, K, K)   Conv2d weight, bias=False, K in (3, 7)
    returns: (N, 1, H, W)   sigmoid attention map, dtype of x
    """
    N, C, H, W = x.shape
    _, two, KH, KW = weight.shape
    assert two == 2 and KH == KW and KH in (3, 7)
    HW = H * W

    # --- pass 1: lane-dense channel stats ------------------------------------------
    x_flat = x.reshape(N, C, HW)                            # free view of contiguous NCHW
    c_tile, chunk, vmem_limit = _pick_tiles(
        C, HW, jnp.dtype(x.dtype).itemsize, max_c_tile=max_c_tile)
    n_csteps = C // c_tile
    n_chunks = c_tile // chunk

    stats_flat = pl.pallas_call(
        functools.partial(_channel_stats_kernel, chunk=chunk, n_chunks=n_chunks),
        out_shape=jax.ShapeDtypeStruct((N, 2, HW), jnp.float32),
        grid_spec=pltpu.PrefetchScalarGridSpec(
            num_scalar_prefetch=0,
            grid=(N, n_csteps),
            in_specs=[pl.BlockSpec((1, c_tile, HW), lambda n, k: (n, k, 0))],
            out_specs=pl.BlockSpec((1, 2, HW), lambda n, k: (n, 0, 0)),
            scratch_shapes=[pltpu.VMEM((1, HW), jnp.float32),      # running sum
                            pltpu.VMEM((1, HW), jnp.float32)]),    # running max
        compiler_params=pltpu.CompilerParams(
            dimension_semantics=("parallel", "arbitrary"),
            vmem_limit_bytes=int(vmem_limit)),
    )(x_flat)

    stats = stats_flat.reshape(N, 2, H, W)                  # free view

    # --- pass 2: banded-matmul conv + sigmoid ---------------------------------------
    A, G = _conv_band_matrices(weight, H, W, C)
    out = pl.pallas_call(
        functools.partial(_conv_sigmoid_kernel, ksize=KH),
        out_shape=jax.ShapeDtypeStruct((N, 1, H, W), x.dtype),
        grid_spec=pltpu.PrefetchScalarGridSpec(
            num_scalar_prefetch=0,
            grid=(N,),
            in_specs=[pl.BlockSpec((1, 2, H, W), lambda n: (n, 0, 0, 0)),
                      pl.BlockSpec((KH, H, H), lambda n: (0, 0, 0)),
                      pl.BlockSpec((2, KH, W, W), lambda n: (0, 0, 0, 0))],
            out_specs=pl.BlockSpec((1, 1, H, W), lambda n: (n, 0, 0, 0))),
        compiler_params=pltpu.CompilerParams(
            dimension_semantics=("parallel",)),
    )(stats, A, G)
    return out


# ---------------------------------------------------------------------------
# Pure-JAX reference (for correctness check)
# ---------------------------------------------------------------------------
def _reference(x, weight):
    avg = jnp.mean(x, axis=1, keepdims=True)
    mx = jnp.max(x, axis=1, keepdims=True)
    stats = jnp.concatenate([avg, mx], axis=1)
    p = weight.shape[2] // 2
    y = lax.conv_general_dilated(
        stats, weight, window_strides=(1, 1), padding=((p, p), (p, p)),
        dimension_numbers=("NCHW", "OIHW", "NCHW"),
        precision=lax.Precision.HIGHEST)
    return jax.nn.sigmoid(y)


# ---------------------------------------------------------------------------
if __name__ == "__main__":
    key = jax.random.PRNGKey(0)
    k1, k2, k3, k4 = jax.random.split(key, 4)

    fwd = jax.jit(spatial_attention, static_argnames=("max_c_tile",))

    # Case 1: realistic channel count; whole C fits in one block (multi-chunk path).
    x1 = jax.random.normal(k1, (2, 384, 16, 16), jnp.float32)
    w1 = jax.random.normal(k2, (1, 2, 7, 7), jnp.float32) / jnp.sqrt(2.0 * 49.0)
    out1 = jax.block_until_ready(fwd(x1, w1))
    ref1 = _reference(x1, w1)
    assert out1.shape == (2, 1, 16, 16), out1.shape
    assert bool(jnp.isfinite(out1).all())
    err1 = float(jnp.max(jnp.abs(out1 - ref1)))
    assert err1 < 1e-4, err1

    # Case 2: force a multi-step channel reduction (grid accumulator / pl.when path).
    out1b = jax.block_until_ready(fwd(x1, w1, max_c_tile=64))
    err1b = float(jnp.max(jnp.abs(out1b - ref1)))
    assert err1b < 1e-4, err1b

    # Case 3: tiny channel count and tiny spatial map.
    x2 = jax.random.normal(k3, (2, 4, 8, 8), jnp.float32)
    w2 = jax.random.normal(k4, (1, 2, 7, 7), jnp.float32) / jnp.sqrt(2.0 * 49.0)
    out2 = jax.block_until_ready(fwd(x2, w2))
    ref2 = _reference(x2, w2)
    assert out2.shape == (2, 1, 8, 8), out2.shape
    err2 = float(jnp.max(jnp.abs(out2 - ref2)))
    assert err2 < 1e-4, err2

    print("KERNEL_OK")
</pallas_src>

<mosaic_0001>
module attributes {stable_mosaic.version = 11 : i64} {
  func.func @_channel_stats_kernel(%arg0: i32, %arg1: i32, %arg2: memref<1x384x256xf32, #tpu.memory_space<vmem>>, %arg3: memref<1x2x256xf32, #tpu.memory_space<vmem>>, %arg4: memref<1x256xf32, #tpu.memory_space<vmem>>, %arg5: memref<1x256xf32, #tpu.memory_space<vmem>>) attributes {dimension_semantics = [#tpu.dimension_semantics<parallel>, #tpu.dimension_semantics<arbitrary>], iteration_bounds = array<i64: 2, 1>, scalar_prefetch = 0 : i64, scratch_operands = 2 : i64, tpu.core_type = #tpu.core_type<tc>, window_params = [{transform_indices = @transform_0, window_bounds = array<i64: 1, 384, 256>}, {transform_indices = @transform_1, window_bounds = array<i64: 1, 2, 256>}]} {
    %c0_i32 = arith.constant 0 : i32
    %0 = arith.cmpi eq, %arg1, %c0_i32 : i32
    %1 = arith.extui %0 : i1 to i32
    %c0_i32_0 = arith.constant 0 : i32
    %2 = arith.cmpi ne, %1, %c0_i32_0 : i32
    scf.if %2 {
      %cst_26 = arith.constant 0.000000e+00 : f32
      %30 = vector.broadcast %cst_26 : f32 to vector<1x256xf32>
      %c0_27 = arith.constant 0 : index
      %c0_28 = arith.constant 0 : index
      %31 = vector.load %arg4[%c0_27, %c0_28] : memref<1x256xf32, #tpu.memory_space<vmem>>, vector<1x256xf32>
      tpu.vector_store %arg4[%c0_27, %c0_28], %30 {strides = array<i32>} : memref<1x256xf32, #tpu.memory_space<vmem>>, vector<1x256xf32>,
      %cst_29 = arith.constant 0xFF800000 : f32
      %32 = vector.broadcast %cst_29 : f32 to vector<1x256xf32>
      %c0_30 = arith.constant 0 : index
      %c0_31 = arith.constant 0 : index
      %33 = vector.load %arg5[%c0_30, %c0_31] : memref<1x256xf32, #tpu.memory_space<vmem>>, vector<1x256xf32>
      tpu.vector_store %arg5[%c0_30, %c0_31], %32 {strides = array<i32>} : memref<1x256xf32, #tpu.memory_space<vmem>>, vector<1x256xf32>,
    } else {
    }
    %c0 = arith.constant 0 : index
    %c0_1 = arith.constant 0 : index
    %c0_2 = arith.constant 0 : index
    %3 = vector.load %arg2[%c0, %c0_1, %c0_2] : memref<1x384x256xf32, #tpu.memory_space<vmem>>, vector<1x192x256xf32>
    %4 = vector.shape_cast %3 : vector<1x192x256xf32> to vector<192x256xf32>
    %c0_3 = arith.constant 0 : index
    %c0_4 = arith.constant 0 : index
    %5 = vector.load %arg4[%c0_3, %c0_4] : memref<1x256xf32, #tpu.memory_space<vmem>>, vector<1x256xf32>
    %cst = arith.constant dense<0.000000e+00> : vector<256xf32>
    %6 = vector.multi_reduction <add>, %4, %cst [0] : vector<192x256xf32> to vector<256xf32>
    %7 = vector.shape_cast %6 : vector<256xf32> to vector<1x256xf32>
    %8 = arith.addf %5, %7 : vector<1x256xf32>
    %c0_5 = arith.constant 0 : index
    %c0_6 = arith.constant 0 : index
    %9 = vector.load %arg4[%c0_5, %c0_6] : memref<1x256xf32, #tpu.memory_space<vmem>>, vector<1x256xf32>
    tpu.vector_store %arg4[%c0_5, %c0_6], %8 {strides = array<i32>} : memref<1x256xf32, #tpu.memory_space<vmem>>, vector<1x256xf32>,
    %c0_7 = arith.constant 0 : index
    %c0_8 = arith.constant 0 : index
    %10 = vector.load %arg5[%c0_7, %c0_8] : memref<1x256xf32, #tpu.memory_space<vmem>>, vector<1x256xf32>
    %cst_9 = arith.constant dense<0xFF800000> : vector<256xf32>
    %11 = vector.multi_reduction <maximumf>, %4, %cst_9 [0] : vector<192x256xf32> to vector<256xf32>
    %12 = vector.shape_cast %11 : vector<256xf32> to vector<1x256xf32>
    %13 = arith.maximumf %10, %12 : vector<1x256xf32>
    %c0_10 = arith.constant 0 : index
    %c0_11 = arith.constant 0 : index
    %14 = vector.load %arg5[%c0_10, %c0_11] : memref<1x256xf32, #tpu.memory_space<vmem>>, vector<1x256xf32>
    tpu.vector_store %arg5[%c0_10, %c0_11], %13 {strides = array<i32>} : memref<1x256xf32, #tpu.memory_space<vmem>>, vector<1x256xf32>,
    %c0_12 = arith.constant 0 : index
    %c192 = arith.constant 192 : index
    %c0_13 = arith.constant 0 : index
    %15 = vector.load %arg2[%c0_12, %c192, %c0_13] : memref<1x384x256xf32, #tpu.memory_space<vmem>>, vector<1x192x256xf32>
    %16 = vector.shape_cast %15 : vector<1x192x256xf32> to vector<192x256xf32>
    %c0_14 = arith.constant 0 : index
    %c0_15 = arith.constant 0 : index
    %17 = vector.load %arg4[%c0_14, %c0_15] : memref<1x256xf32, #tpu.memory_space<vmem>>, vector<1x256xf32>
    %cst_16 = arith.constant dense<0.000000e+00> : vector<256xf32>
    %18 = vector.multi_reduction <add>, %16, %cst_16 [0] : vector<192x256xf32> to vector<256xf32>
    %19 = vector.shape_cast %18 : vector<256xf32> to vector<1x256xf32>
    %20 = arith.addf %17, %19 : vector<1x256xf32>
    %c0_17 = arith.constant 0 : index
    %c0_18 = arith.constant 0 : index
    %21 = vector.load %arg4[%c0_17, %c0_18] : memref<1x256xf32, #tpu.memory_space<vmem>>, vector<1x256xf32>
    tpu.vector_store %arg4[%c0_17, %c0_18], %20 {strides = array<i32>} : memref<1x256xf32, #tpu.memory_space<vmem>>, vector<1x256xf32>,
    %c0_19 = arith.constant 0 : index
    %c0_20 = arith.constant 0 : index
    %22 = vector.load %arg5[%c0_19, %c0_20] : memref<1x256xf32, #tpu.memory_space<vmem>>, vector<1x256xf32>
    %cst_21 = arith.constant dense<0xFF800000> : vector<256xf32>
    %23 = vector.multi_reduction <maximumf>, %16, %cst_21 [0] : vector<192x256xf32> to vector<256xf32>
    %24 = vector.shape_cast %23 : vector<256xf32> to vector<1x256xf32>
    %25 = arith.maximumf %22, %24 : vector<1x256xf32>
    %c0_22 = arith.constant 0 : index
    %c0_23 = arith.constant 0 : index
    %26 = vector.load %arg5[%c0_22, %c0_23] : memref<1x256xf32, #tpu.memory_space<vmem>>, vector<1x256xf32>
    tpu.vector_store %arg5[%c0_22, %c0_23], %25 {strides = array<i32>} : memref<1x256xf32, #tpu.memory_space<vmem>>, vector<1x256xf32>,
    %c0_i32_24 = arith.constant 0 : i32
    %27 = arith.cmpi eq, %arg1, %c0_i32_24 : i32
    %28 = arith.extui %27 : i1 to i32
    %c0_i32_25 = arith.constant 0 : i32
    %29 = arith.cmpi ne, %28, %c0_i32_25 : i32
    scf.if %29 {
      %c0_26 = arith.constant 0 : index
      %c0_27 = arith.constant 0 : index
      %30 = vector.load %arg4[%c0_26, %c0_27] : memref<1x256xf32, #tpu.memory_space<vmem>>, vector<1x256xf32>
      %c0_28 = arith.constant 0 : index
      %c0_29 = arith.constant 0 : index
      %c0_30 = arith.constant 0 : index
      %31 = vector.load %arg3[%c0_28, %c0_29, %c0_30] : memref<1x2x256xf32, #tpu.memory_space<vmem>>, vector<1x1x256xf32>
      %32 = vector.shape_cast %31 : vector<1x1x256xf32> to vector<1x256xf32>
      %33 = vector.shape_cast %30 : vector<1x256xf32> to vector<1x1x256xf32>
      tpu.vector_store %arg3[%c0_28, %c0_29, %c0_30], %33 {strides = array<i32>} : memref<1x2x256xf32, #tpu.memory_space<vmem>>, vector<1x1x256xf32>,
      %c0_31 = arith.constant 0 : index
      %c0_32 = arith.constant 0 : index
      %34 = vector.load %arg5[%c0_31, %c0_32] : memref<1x256xf32, #tpu.memory_space<vmem>>, vector<1x256xf32>
      %c0_33 = arith.constant 0 : index
      %c1 = arith.constant 1 : index
      %c0_34 = arith.constant 0 : index
      %35 = vector.load %arg3[%c0_33, %c1, %c0_34] : memref<1x2x256xf32, #tpu.memory_space<vmem>>, vector<1x1x256xf32>
      %36 = vector.shape_cast %35 : vector<1x1x256xf32> to vector<1x256xf32>
      %37 = vector.shape_cast %34 : vector<1x256xf32> to vector<1x1x256xf32>
      tpu.vector_store %arg3[%c0_33, %c1, %c0_34], %37 {strides = array<i32>} : memref<1x2x256xf32, #tpu.memory_space<vmem>>, vector<1x1x256xf32>,
    } else {
    }
    return
  }
  func.func @transform_0(%arg0: i32, %arg1: i32) -> (i32, i32, i32) {
    %c0_i32 = arith.constant 0 : i32
    %c0_i32_0 = arith.constant 0 : i32
    return %arg0, %arg1, %c0_i32 : i32, i32, i32
  }
  func.func @transform_1(%arg0: i32, %arg1: i32) -> (i32, i32, i32) {
    %c0_i32 = arith.constant 0 : i32
    %c0_i32_0 = arith.constant 0 : i32
    %c0_i32_1 = arith.constant 0 : i32
    return %arg0, %c0_i32, %c0_i32_0 : i32, i32, i32
  }
}

module attributes {stable_mosaic.version = 11 : i64} {
  func.func @_conv_sigmoid_kernel(%arg0: i32, %arg1: memref<1x2x16x16xf32, #tpu.memory_space<vmem>>, %arg2: memref<7x16x16xf32, #tpu.memory_space<vmem>>, %arg3: memref<2x7x16x16xf32, #tpu.memory_space<vmem>>, %arg4: memref<1x1x16x16xf32, #tpu.memory_space<vmem>>) attributes {dimension_semantics = [#tpu.dimension_semantics<parallel>], iteration_bounds = array<i64: 2>, scalar_prefetch = 0 : i64, scratch_operands = 0 : i64, tpu.core_type = #tpu.core_type<tc>, window_params = [{transform_indices = @transform_0, window_bounds = array<i64: 1, 2, 16, 16>}, {pipeline_mode = #tpu.pipeline_mode<synchronous>, transform_indices = @transform_1, window_bounds = array<i64: 7, 16, 16>}, {pipeline_mode = #tpu.pipeline_mode<synchronous>, transform_indices = @transform_2, window_bounds = array<i64: 2, 7, 16, 16>}, {transform_indices = @transform_3, window_bounds = array<i64: 1, 1, 16, 16>}]} {
    %c0 = arith.constant 0 : index
    %c0_0 = arith.constant 0 : index
    %c0_1 = arith.constant 0 : index
    %c0_2 = arith.constant 0 : index
    %0 = vector.load %arg1[%c0, %c0_0, %c0_1, %c0_2] : memref<1x2x16x16xf32, #tpu.memory_space<vmem>>, vector<1x1x16x16xf32>
    %1 = vector.shape_cast %0 : vector<1x1x16x16xf32> to vector<16x16xf32>
    %c0_3 = arith.constant 0 : index
    %c1 = arith.constant 1 : index
    %c0_4 = arith.constant 0 : index
    %c0_5 = arith.constant 0 : index
    %2 = vector.load %arg1[%c0_3, %c1, %c0_4, %c0_5] : memref<1x2x16x16xf32, #tpu.memory_space<vmem>>, vector<1x1x16x16xf32>
    %3 = vector.shape_cast %2 : vector<1x1x16x16xf32> to vector<16x16xf32>
    %cst = arith.constant 0.000000e+00 : f32
    %4 = vector.broadcast %cst : f32 to vector<16x16xf32>
    %c0_6 = arith.constant 0 : index
    %c0_7 = arith.constant 0 : index
    %c0_8 = arith.constant 0 : index
    %c0_9 = arith.constant 0 : index
    %5 = vector.load %arg3[%c0_6, %c0_7, %c0_8, %c0_9] : memref<2x7x16x16xf32, #tpu.memory_space<vmem>>, vector<1x1x16x16xf32>
    %6 = vector.shape_cast %5 : vector<1x1x16x16xf32> to vector<16x16xf32>
    %cst_10 = arith.constant dense<0.000000e+00> : vector<16x16xf32>
    %7 = tpu.matmul %1, %6, %cst_10 {dimension_numbers = #tpu.dot_dimension_numbers<[1], [0], [0], [1], [0, 0, 1, 1], [], []>, precision = #tpu.contract_precision<fp32>} : vector<16x16xf32>, vector<16x16xf32>, vector<16x16xf32> -> vector<16x16xf32>
    %c1_11 = arith.constant 1 : index
    %c0_12 = arith.constant 0 : index
    %c0_13 = arith.constant 0 : index
    %c0_14 = arith.constant 0 : index
    %8 = vector.load %arg3[%c1_11, %c0_12, %c0_13, %c0_14] : memref<2x7x16x16xf32, #tpu.memory_space<vmem>>, vector<1x1x16x16xf32>
    %9 = vector.shape_cast %8 : vector<1x1x16x16xf32> to vector<16x16xf32>
    %cst_15 = arith.constant dense<0.000000e+00> : vector<16x16xf32>
    %10 = tpu.matmul %3, %9, %cst_15 {dimension_numbers = #tpu.dot_dimension_numbers<[1], [0], [0], [1], [0, 0, 1, 1], [], []>, precision = #tpu.contract_precision<fp32>} : vector<16x16xf32>, vector<16x16xf32>, vector<16x16xf32> -> vector<16x16xf32>
    %11 = arith.addf %7, %10 : vector<16x16xf32>
    %c0_16 = arith.constant 0 : index
    %c0_17 = arith.constant 0 : index
    %c0_18 = arith.constant 0 : index
    %12 = vector.load %arg2[%c0_16, %c0_17, %c0_18] : memref<7x16x16xf32, #tpu.memory_space<vmem>>, vector<1x16x16xf32>
    %13 = vector.shape_cast %12 : vector<1x16x16xf32> to vector<16x16xf32>
    %cst_19 = arith.constant dense<0.000000e+00> : vector<16x16xf32>
    %14 = tpu.matmul %13, %11, %cst_19 {dimension_numbers = #tpu.dot_dimension_numbers<[1], [0], [0], [1], [0, 0, 1, 1], [], []>, precision = #tpu.contract_precision<fp32>} : vector<16x16xf32>, vector<16x16xf32>, vector<16x16xf32> -> vector<16x16xf32>
    %15 = arith.addf %4, %14 : vector<16x16xf32>
    %c0_20 = arith.constant 0 : index
    %c1_21 = arith.constant 1 : index
    %c0_22 = arith.constant 0 : index
    %c0_23 = arith.constant 0 : index
    %16 = vector.load %arg3[%c0_20, %c1_21, %c0_22, %c0_23] : memref<2x7x16x16xf32, #tpu.memory_space<vmem>>, vector<1x1x16x16xf32>
    %17 = vector.shape_cast %16 : vector<1x1x16x16xf32> to vector<16x16xf32>
    %cst_24 = arith.constant dense<0.000000e+00> : vector<16x16xf32>
    %18 = tpu.matmul %1, %17, %cst_24 {dimension_numbers = #tpu.dot_dimension_numbers<[1], [0], [0], [1], [0, 0, 1, 1], [], []>, precision = #tpu.contract_precision<fp32>} : vector<16x16xf32>, vector<16x16xf32>, vector<16x16xf32> -> vector<16x16xf32>
    %c1_25 = arith.constant 1 : index
    %c1_26 = arith.constant 1 : index
    %c0_27 = arith.constant 0 : index
    %c0_28 = arith.constant 0 : index
    %19 = vector.load %arg3[%c1_25, %c1_26, %c0_27, %c0_28] : memref<2x7x16x16xf32, #tpu.memory_space<vmem>>, vector<1x1x16x16xf32>
    %20 = vector.shape_cast %19 : vector<1x1x16x16xf32> to vector<16x16xf32>
    %cst_29 = arith.constant dense<0.000000e+00> : vector<16x16xf32>
    %21 = tpu.matmul %3, %20, %cst_29 {dimension_numbers = #tpu.dot_dimension_numbers<[1], [0], [0], [1], [0, 0, 1, 1], [], []>, precision = #tpu.contract_precision<fp32>} : vector<16x16xf32>, vector<16x16xf32>, vector<16x16xf32> -> vector<16x16xf32>
    %22 = arith.addf %18, %21 : vector<16x16xf32>
    %c1_30 = arith.constant 1 : index
    %c0_31 = arith.constant 0 : index
    %c0_32 = arith.constant 0 : index
    %23 = vector.load %arg2[%c1_30, %c0_31, %c0_32] : memref<7x16x16xf32, #tpu.memory_space<vmem>>, vector<1x16x16xf32>
    %24 = vector.shape_cast %23 : vector<1x16x16xf32> to vector<16x16xf32>
    %cst_33 = arith.constant dense<0.000000e+00> : vector<16x16xf32>
    %25 = tpu.matmul %24, %22, %cst_33 {dimension_numbers = #tpu.dot_dimension_numbers<[1], [0], [0], [1], [0, 0, 1, 1], [], []>, precision = #tpu.contract_precision<fp32>} : vector<16x16xf32>, vector<16x16xf32>, vector<16x16xf32> -> vector<16x16xf32>
    %26 = arith.addf %15, %25 : vector<16x16xf32>
    %c0_34 = arith.constant 0 : index
    %c2 = arith.constant 2 : index
    %c0_35 = arith.constant 0 : index
    %c0_36 = arith.constant 0 : index
    %27 = vector.load %arg3[%c0_34, %c2, %c0_35, %c0_36] : memref<2x7x16x16xf32, #tpu.memory_space<vmem>>, vector<1x1x16x16xf32>
    %28 = vector.shape_cast %27 : vector<1x1x16x16xf32> to vector<16x16xf32>
    %cst_37 = arith.constant dense<0.000000e+00> : vector<16x16xf32>
    %29 = tpu.matmul %1, %28, %cst_37 {dimension_numbers = #tpu.dot_dimension_numbers<[1], [0], [0], [1], [0, 0, 1, 1], [], []>, precision = #tpu.contract_precision<fp32>} : vector<16x16xf32>, vector<16x16xf32>, vector<16x16xf32> -> vector<16x16xf32>
    %c1_38 = arith.constant 1 : index
    %c2_39 = arith.constant 2 : index
    %c0_40 = arith.constant 0 : index
    %c0_41 = arith.constant 0 : index
    %30 = vector.load %arg3[%c1_38, %c2_39, %c0_40, %c0_41] : memref<2x7x16x16xf32, #tpu.memory_space<vmem>>, vector<1x1x16x16xf32>
    %31 = vector.shape_cast %30 : vector<1x1x16x16xf32> to vector<16x16xf32>
    %cst_42 = arith.constant dense<0.000000e+00> : vector<16x16xf32>
    %32 = tpu.matmul %3, %31, %cst_42 {dimension_numbers = #tpu.dot_dimension_numbers<[1], [0], [0], [1], [0, 0, 1, 1], [], []>, precision = #tpu.contract_precision<fp32>} : vector<16x16xf32>, vector<16x16xf32>, vector<16x16xf32> -> vector<16x16xf32>
    %33 = arith.addf %29, %32 : vector<16x16xf32>
    %c2_43 = arith.constant 2 : index
    %c0_44 = arith.constant 0 : index
    %c0_45 = arith.constant 0 : index
    %34 = vector.load %arg2[%c2_43, %c0_44, %c0_45] : memref<7x16x16xf32, #tpu.memory_space<vmem>>, vector<1x16x16xf32>
    %35 = vector.shape_cast %34 : vector<1x16x16xf32> to vector<16x16xf32>
    %cst_46 = arith.constant dense<0.000000e+00> : vector<16x16xf32>
    %36 = tpu.matmul %35, %33, %cst_46 {dimension_numbers = #tpu.dot_dimension_numbers<[1], [0], [0], [1], [0, 0, 1, 1], [], []>, precision = #tpu.contract_precision<fp32>} : vector<16x16xf32>, vector<16x16xf32>, vector<16x16xf32> -> vector<16x16xf32>
    %37 = arith.addf %26, %36 : vector<16x16xf32>
    %c0_47 = arith.constant 0 : index
    %c3 = arith.constant 3 : index
    %c0_48 = arith.constant 0 : index
    %c0_49 = arith.constant 0 : index
    %38 = vector.load %arg3[%c0_47, %c3, %c0_48, %c0_49] : memref<2x7x16x16xf32, #tpu.memory_space<vmem>>, vector<1x1x16x16xf32>
    %39 = vector.shape_cast %38 : vector<1x1x16x16xf32> to vector<16x16xf32>
    %cst_50 = arith.constant dense<0.000000e+00> : vector<16x16xf32>
    %40 = tpu.matmul %1, %39, %cst_50 {dimension_numbers = #tpu.dot_dimension_numbers<[1], [0], [0], [1], [0, 0, 1, 1], [], []>, precision = #tpu.contract_precision<fp32>} : vector<16x16xf32>, vector<16x16xf32>, vector<16x16xf32> -> vector<16x16xf32>
    %c1_51 = arith.constant 1 : index
    %c3_52 = arith.constant 3 : index
    %c0_53 = arith.constant 0 : index
    %c0_54 = arith.constant 0 : index
    %41 = vector.load %arg3[%c1_51, %c3_52, %c0_53, %c0_54] : memref<2x7x16x16xf32, #tpu.memory_space<vmem>>, vector<1x1x16x16xf32>
    %42 = vector.shape_cast %41 : vector<1x1x16x16xf32> to vector<16x16xf32>
    %cst_55 = arith.constant dense<0.000000e+00> : vector<16x16xf32>
    %43 = tpu.matmul %3, %42, %cst_55 {dimension_numbers = #tpu.dot_dimension_numbers<[1], [0], [0], [1], [0, 0, 1, 1], [], []>, precision = #tpu.contract_precision<fp32>} : vector<16x16xf32>, vector<16x16xf32>, vector<16x16xf32> -> vector<16x16xf32>
    %44 = arith.addf %40, %43 : vector<16x16xf32>
    %c3_56 = arith.constant 3 : index
    %c0_57 = arith.constant 0 : index
    %c0_58 = arith.constant 0 : index
    %45 = vector.load %arg2[%c3_56, %c0_57, %c0_58] : memref<7x16x16xf32, #tpu.memory_space<vmem>>, vector<1x16x16xf32>
    %46 = vector.shape_cast %45 : vector<1x16x16xf32> to vector<16x16xf32>
    %cst_59 = arith.constant dense<0.000000e+00> : vector<16x16xf32>
    %47 = tpu.matmul %46, %44, %cst_59 {dimension_numbers = #tpu.dot_dimension_numbers<[1], [0], [0], [1], [0, 0, 1, 1], [], []>, precision = #tpu.contract_precision<fp32>} : vector<16x16xf32>, vector<16x16xf32>, vector<16x16xf32> -> vector<16x16xf32>
    %48 = arith.addf %37, %47 : vector<16x16xf32>
    %c0_60 = arith.constant 0 : index
    %c4 = arith.constant 4 : index
    %c0_61 = arith.constant 0 : index
    %c0_62 = arith.constant 0 : index
    %49 = vector.load %arg3[%c0_60, %c4, %c0_61, %c0_62] : memref<2x7x16x16xf32, #tpu.memory_space<vmem>>, vector<1x1x16x16xf32>
    %50 = vector.shape_cast %49 : vector<1x1x16x16xf32> to vector<16x16xf32>
    %cst_63 = arith.constant dense<0.000000e+00> : vector<16x16xf32>
    %51 = tpu.matmul %1, %50, %cst_63 {dimension_numbers = #tpu.dot_dimension_numbers<[1], [0], [0], [1], [0, 0, 1, 1], [], []>, precision = #tpu.contract_precision<fp32>} : vector<16x16xf32>, vector<16x16xf32>, vector<16x16xf32> -> vector<16x16xf32>
    %c1_64 = arith.constant 1 : index
    %c4_65 = arith.constant 4 : index
    %c0_66 = arith.constant 0 : index
    %c0_67 = arith.constant 0 : index
    %52 = vector.load %arg3[%c1_64, %c4_65, %c0_66, %c0_67] : memref<2x7x16x16xf32, #tpu.memory_space<vmem>>, vector<1x1x16x16xf32>
    %53 = vector.shape_cast %52 : vector<1x1x16x16xf32> to vector<16x16xf32>
    %cst_68 = arith.constant dense<0.000000e+00> : vector<16x16xf32>
    %54 = tpu.matmul %3, %53, %cst_68 {dimension_numbers = #tpu.dot_dimension_numbers<[1], [0], [0], [1], [0, 0, 1, 1], [], []>, precision = #tpu.contract_precision<fp32>} : vector<16x16xf32>, vector<16x16xf32>, vector<16x16xf32> -> vector<16x16xf32>
    %55 = arith.addf %51, %54 : vector<16x16xf32>
    %c4_69 = arith.constant 4 : index
    %c0_70 = arith.constant 0 : index
    %c0_71 = arith.constant 0 : index
    %56 = vector.load %arg2[%c4_69, %c0_70, %c0_71] : memref<7x16x16xf32, #tpu.memory_space<vmem>>, vector<1x16x16xf32>
    %57 = vector.shape_cast %56 : vector<1x16x16xf32> to vector<16x16xf32>
    %cst_72 = arith.constant dense<0.000000e+00> : vector<16x16xf32>
    %58 = tpu.matmul %57, %55, %cst_72 {dimension_numbers = #tpu.dot_dimension_numbers<[1], [0], [0], [1], [0, 0, 1, 1], [], []>, precision = #tpu.contract_precision<fp32>} : vector<16x16xf32>, vector<16x16xf32>, vector<16x16xf32> -> vector<16x16xf32>
    %59 = arith.addf %48, %58 : vector<16x16xf32>
    %c0_73 = arith.constant 0 : index
    %c5 = arith.constant 5 : index
    %c0_74 = arith.constant 0 : index
    %c0_75 = arith.constant 0 : index
    %60 = vector.load %arg3[%c0_73, %c5, %c0_74, %c0_75] : memref<2x7x16x16xf32, #tpu.memory_space<vmem>>, vector<1x1x16x16xf32>
    %61 = vector.shape_cast %60 : vector<1x1x16x16xf32> to vector<16x16xf32>
    %cst_76 = arith.constant dense<0.000000e+00> : vector<16x16xf32>
    %62 = tpu.matmul %1, %61, %cst_76 {dimension_numbers = #tpu.dot_dimension_numbers<[1], [0], [0], [1], [0, 0, 1, 1], [], []>, precision = #tpu.contract_precision<fp32>} : vector<16x16xf32>, vector<16x16xf32>, vector<16x16xf32> -> vector<16x16xf32>
    %c1_77 = arith.constant 1 : index
    %c5_78 = arith.constant 5 : index
    %c0_79 = arith.constant 0 : index
    %c0_80 = arith.constant 0 : index
    %63 = vector.load %arg3[%c1_77, %c5_78, %c0_79, %c0_80] : memref<2x7x16x16xf32, #tpu.memory_space<vmem>>, vector<1x1x16x16xf32>
    %64 = vector.shape_cast %63 : vector<1x1x16x16xf32> to vector<16x16xf32>
    %cst_81 = arith.constant dense<0.000000e+00> : vector<16x16xf32>
    %65 = tpu.matmul %3, %64, %cst_81 {dimension_numbers = #tpu.dot_dimension_numbers<[1], [0], [0], [1], [0, 0, 1, 1], [], []>, precision = #tpu.contract_precision<fp32>} : vector<16x16xf32>, vector<16x16xf32>, vector<16x16xf32> -> vector<16x16xf32>
    %66 = arith.addf %62, %65 : vector<16x16xf32>
    %c5_82 = arith.constant 5 : index
    %c0_83 = arith.constant 0 : index
    %c0_84 = arith.constant 0 : index
    %67 = vector.load %arg2[%c5_82, %c0_83, %c0_84] : memref<7x16x16xf32, #tpu.memory_space<vmem>>, vector<1x16x16xf32>
    %68 = vector.shape_cast %67 : vector<1x16x16xf32> to vector<16x16xf32>
    %cst_85 = arith.constant dense<0.000000e+00> : vector<16x16xf32>
    %69 = tpu.matmul %68, %66, %cst_85 {dimension_numbers = #tpu.dot_dimension_numbers<[1], [0], [0], [1], [0, 0, 1, 1], [], []>, precision = #tpu.contract_precision<fp32>} : vector<16x16xf32>, vector<16x16xf32>, vector<16x16xf32> -> vector<16x16xf32>
    %70 = arith.addf %59, %69 : vector<16x16xf32>
    %c0_86 = arith.constant 0 : index
    %c6 = arith.constant 6 : index
    %c0_87 = arith.constant 0 : index
    %c0_88 = arith.constant 0 : index
    %71 = vector.load %arg3[%c0_86, %c6, %c0_87, %c0_88] : memref<2x7x16x16xf32, #tpu.memory_space<vmem>>, vector<1x1x16x16xf32>
    %72 = vector.shape_cast %71 : vector<1x1x16x16xf32> to vector<16x16xf32>
    %cst_89 = arith.constant dense<0.000000e+00> : vector<16x16xf32>
    %73 = tpu.matmul %1, %72, %cst_89 {dimension_numbers = #tpu.dot_dimension_numbers<[1], [0], [0], [1], [0, 0, 1, 1], [], []>, precision = #tpu.contract_precision<fp32>} : vector<16x16xf32>, vector<16x16xf32>, vector<16x16xf32> -> vector<16x16xf32>
    %c1_90 = arith.constant 1 : index
    %c6_91 = arith.constant 6 : index
    %c0_92 = arith.constant 0 : index
    %c0_93 = arith.constant 0 : index
    %74 = vector.load %arg3[%c1_90, %c6_91, %c0_92, %c0_93] : memref<2x7x16x16xf32, #tpu.memory_space<vmem>>, vector<1x1x16x16xf32>
    %75 = vector.shape_cast %74 : vector<1x1x16x16xf32> to vector<16x16xf32>
    %cst_94 = arith.constant dense<0.000000e+00> : vector<16x16xf32>
    %76 = tpu.matmul %3, %75, %cst_94 {dimension_numbers = #tpu.dot_dimension_numbers<[1], [0], [0], [1], [0, 0, 1, 1], [], []>, precision = #tpu.contract_precision<fp32>} : vector<16x16xf32>, vector<16x16xf32>, vector<16x16xf32> -> vector<16x16xf32>
    %77 = arith.addf %73, %76 : vector<16x16xf32>
    %c6_95 = arith.constant 6 : index
    %c0_96 = arith.constant 0 : index
    %c0_97 = arith.constant 0 : index
    %78 = vector.load %arg2[%c6_95, %c0_96, %c0_97] : memref<7x16x16xf32, #tpu.memory_space<vmem>>, vector<1x16x16xf32>
    %79 = vector.shape_cast %78 : vector<1x16x16xf32> to vector<16x16xf32>
    %cst_98 = arith.constant dense<0.000000e+00> : vector<16x16xf32>
    %80 = tpu.matmul %79, %77, %cst_98 {dimension_numbers = #tpu.dot_dimension_numbers<[1], [0], [0], [1], [0, 0, 1, 1], [], []>, precision = #tpu.contract_precision<fp32>} : vector<16x16xf32>, vector<16x16xf32>, vector<16x16xf32> -> vector<16x16xf32>
    %81 = arith.addf %70, %80 : vector<16x16xf32>
    %82 = arith.negf %81 : vector<16x16xf32>
    %83 = math.exp %82 : vector<16x16xf32>
    %cst_99 = arith.constant 1.000000e+00 : f32
    %84 = vector.broadcast %cst_99 : f32 to vector<16x16xf32>
    %85 = arith.addf %84, %83 : vector<16x16xf32>
    %86 = arith.divf %84, %85 : vector<16x16xf32>
    %c0_100 = arith.constant 0 : index
    %c0_101 = arith.constant 0 : index
    %c0_102 = arith.constant 0 : index
    %c0_103 = arith.constant 0 : index
    %87 = vector.load %arg4[%c0_100, %c0_101, %c0_102, %c0_103] : memref<1x1x16x16xf32, #tpu.memory_space<vmem>>, vector<1x1x16x16xf32>
    %88 = vector.shape_cast %87 : vector<1x1x16x16xf32> to vector<16x16xf32>
    %89 = vector.shape_cast %86 : vector<16x16xf32> to vector<1x1x16x16xf32>
    tpu.vector_store %arg4[%c0_100, %c0_101, %c0_102, %c0_103], %89 {strides = array<i32>} : memref<1x1x16x16xf32, #tpu.memory_space<vmem>>, vector<1x1x16x16xf32>,
    return
  }
  func.func @transform_0(%arg0: i32) -> (i32, i32, i32, i32) {
    %c0_i32 = arith.constant 0 : i32
    %c0_i32_0 = arith.constant 0 : i32
    %c0_i32_1 = arith.constant 0 : i32
    %c0_i32_2 = arith.constant 0 : i32
    return %arg0, %c0_i32, %c0_i32_0, %c0_i32_1 : i32, i32, i32, i32
  }
  func.func @transform_1(%arg0: i32) -> (i32, i32, i32) {
    %c0_i32 = arith.constant 0 : i32
    %c0_i32_0 = arith.constant 0 : i32
    %c0_i32_1 = arith.constant 0 : i32
    %c0_i32_2 = arith.constant 0 : i32
    return %c0_i32, %c0_i32_0, %c0_i32_1 : i32, i32, i32
  }
  func.func @transform_2(%arg0: i32) -> (i32, i32, i32, i32) {
    %c0_i32 = arith.constant 0 : i32
    %c0_i32_0 = arith.constant 0 : i32
    %c0_i32_1 = arith.constant 0 : i32
    %c0_i32_2 = arith.constant 0 : i32
    %c0_i32_3 = arith.constant 0 : i32
    return %c0_i32, %c0_i32_0, %c0_i32_1, %c0_i32_2 : i32, i32, i32, i32
  }
  func.func @transform_3(%arg0: i32) -> (i32, i32, i32, i32) {
    %c0_i32 = arith.constant 0 : i32
    %c0_i32_0 = arith.constant 0 : i32
    %c0_i32_1 = arith.constant 0 : i32
    %c0_i32_2 = arith.constant 0 : i32
    return %arg0, %c0_i32, %c0_i32_0, %c0_i32_1 : i32, i32, i32, i32
  }
}

</mosaic_0001>

<bundles_post_ra>
// kernel: spatial_attention.2
= control target key start
LH: loop header
LB: loop body
LE: loop exit
PB: predicated region body
PF: predicated region fallthrough
CT: control target
= control target key end

     0   :  { %s731_s6 = smov 0   ;;  %s733_s7 = smov 0   ;;  %s990_s0 = inlined_call_operand.vmem [shape: f32[2,384,256], index: 0, kind: input, shape index: {}]   ;;  %s991_s1 = inlined_call_operand.vmem [shape: f32[2,2,256], index: 1, kind: output, shape index: {}]  }
   0x1   :  { %s735_s8 = smov 0  }
   0x2 LB: > { %s23_s9 = sadd.s32 1, %s712_s7  ;;  %p658_p0 = scmp.ge.s32.totalorder %s716_s8, 1  ;;  %s716_s8 = sphi %s735_s8, %s11_s8   ;;  %s712_s7 = sphi %s733_s7, %s999_s7   ;;  %s708_s6 = sphi %s731_s6, %s998_s6  }
   0x3   : > { %p25_p1 = scmp.ge.s32.totalorder %s23_s9, 2  ;;  %p107_p2 = scmp.lt.s32.totalorder %s716_s8, 3 }
   0x5   : > { %s1001_s9 = smov (%p25_p1, %s23_s9), 0  ;;  %p108_p3 = pnand %p658_p0, %p107_p2 }
   0x6   : > { %v152_v0 = vlaneseq (!%p108_p3)  ;;  %p133_p4 = scmp.lt.s32.totalorder (!%p108_p3), %s708_s6, 1  ;;  %v718_v2 = vmov (!%p108_p3), 0.0   ;;  %v719_v3 = vmov (!%p108_p3), -inf   ;;  %v720_v30 = vmov (!%p108_p3), 1966171168  }
   0x7   : > { %111 = sbr.rel (%p108_p3) target bundleno = 111 (0x6f), region = 24  ;;  %v269_v31 = vunpack.c.l.s4 (!%p108_p3), %v720_v30 }
   0x8   : > { %vm749_vm0 = vcmp.lt.s32.totalorder (!%p108_p3), %v152_v0, 256  ;;  %v272_v45 = vshrl.u32 (!%p108_p3), %v152_v0, 7 }
   0x9   : > { %156 = vst.msk [vmem:[#allocation2] sm:$0x3] (!%p108_p3), %vm749_vm0, %v718_v2  ;;  %157 = vst.msk [vmem:[#allocation3] sm:$0x3] (!%p108_p3), %vm749_vm0, %v719_v3  ;;  %v270_v44 = vunpack.c.0.s8 (!%p108_p3), %v269_v31 }
   0xb   : > { %v813_v58 = vsub.s32 (!%p108_p3), %v270_v44, %v272_v45 }
   0xe   : > { %s1003_s6 = smov (!%p133_p4, %s708_s6), 1 }
   0xf   : > { %s666_s10 = smul.u32 768, %s1003_s6  ;;  %s665_s14 = sshll.u32 %s1003_s6, 2 }
  0x10   : > { %s147_s17 = scalar_lea.vmem %s991_s1, %s665_s14 }
  0x11   : > { %s763_s13 = scalar_lea.vmem %s990_s0, %s666_s10 }
  0x12   : > { %v766_v4 = vld [vmem:[%s763_s13] sm:$0xff]  ;;  %v769_v5 = vld [vmem:[%s763_s13 + $0x8] sm:$0xff]  ;;  %v772_v6 = vld [vmem:[%s763_s13 + $0x10] sm:$0xff] }
  0x13   : > { %v775_v7 = vld [vmem:[%s763_s13 + $0x18] sm:$0xff]  ;;  %v778_v8 = vld [vmem:[%s763_s13 + $0x20] sm:$0xff]  ;;  %v781_v9 = vld [vmem:[%s763_s13 + $0x28] sm:$0xff]  ;;  %v207_v10 = vadd.f32 %v772_v6, %v766_v4 }
  0x14   : > { %v786_v11 = vld [vmem:[%s763_s13 + $0x30] sm:$0xff]  ;;  %v789_v12 = vld [vmem:[%s763_s13 + $0x38] sm:$0xff]  ;;  %v166_v13 = vld [vmem:[%s763_s13 + $0x40] sm:$0xff]  ;;  %v236_v14 = vadd.f32 %v775_v7, %v769_v5 }
  0x15   : > { %v167_v15 = vld [vmem:[%s763_s13 + $0x48] sm:$0xff]  ;;  %v168_v16 = vld [vmem:[%s763_s13 + $0x50] sm:$0xff]  ;;  %v169_v17 = vld [vmem:[%s763_s13 + $0x58] sm:$0xff]  ;;  %v208_v18 = vadd.f32 %v207_v10, %v778_v8  ;;  %v290_v10 = vmax.f32 %v766_v4, %v778_v8  ;;  %v995_v4 = vmax.f32 %v775_v7, %v789_v12 }
  0x16   : > { %v292_v19 = vmax.f32 %v168_v16, %v166_v13  ;;  %v321_v20 = vmax.f32 %v169_v17, %v167_v15  ;;  %v170_v21 = vld [vmem:[%s763_s13 + $0x60] sm:$0xff]  ;;  %v171_v22 = vld [vmem:[%s763_s13 + $0x68] sm:$0xff]  ;;  %v237_v23 = vadd.f32 %v236_v14, %v781_v9  ;;  %v172_v24 = vld [vmem:[%s763_s13 + $0x70] sm:$0xff] }
  0x17   : > { %v173_v25 = vld [vmem:[%s763_s13 + $0x78] sm:$0xff]  ;;  %v209_v26 = vadd.f32 %v208_v18, %v786_v11  ;;  %v174_v32 = vld [vmem:[%s763_s13 + $0x80] sm:$0xff]  ;;  %v175_v33 = vld [vmem:[%s763_s13 + $0x88] sm:$0xff]  ;;  %v319_v18 = vmax.f32 %v769_v5, %v781_v9 }
  0x18   : > { %v293_v27 = vmax.f32 %v170_v21, %v292_v19  ;;  %v322_v28 = vmax.f32 %v171_v22, %v321_v20  ;;  %v238_v29 = vadd.f32 %v237_v23, %v789_v12  ;;  %v176_v38 = vld [vmem:[%s763_s13 + $0x90] sm:$0xff]  ;;  %v177_v39 = vld [vmem:[%s763_s13 + $0x98] sm:$0xff]  ;;  %v178_v46 = vld [vmem:[%s763_s13 + $0xa0] sm:$0xff] }
  0x19   : > { %v210_v34 = vadd.f32 %v209_v26, %v166_v13  ;;  %v179_v47 = vld [vmem:[%s763_s13 + $0xa8] sm:$0xff]  ;;  %v180_v52 = vld [vmem:[%s763_s13 + $0xb0] sm:$0xff]  ;;  %v181_v53 = vld [vmem:[%s763_s13 + $0xb8] sm:$0xff] }
  0x1a   : > { %v294_v35 = vmax.f32 %v172_v24, %v293_v27  ;;  %v323_v36 = vmax.f32 %v173_v25, %v322_v28  ;;  %v239_v37 = vadd.f32 %v238_v29, %v167_v15  ;;  %v182_v59 = vld [vmem:[%s763_s13 + $0xc0] sm:$0xff]  ;;  %v183_v60 = vld [vmem:[%s763_s13 + $0xc8] sm:$0xff]  ;;  %v184_v0 = vld [vmem:[%s763_s13 + $0xd0] sm:$0xff] }
  0x1b   : > { %v211_v40 = vadd.f32 %v210_v34, %v168_v16  ;;  %v819_v2 = vld [vmem:[%s763_s13 + $0xd8] sm:$0xff]  ;;  %v824_v13 = vld [vmem:[%s763_s13 + $0x180] sm:$0xff]  ;;  %v830_v15 = vld [vmem:[%s763_s13 + $0xe8] sm:$0xff] }
  0x1c   : > { %v295_v41 = vmax.f32 %v174_v32, %v294_v35  ;;  %v324_v42 = vmax.f32 %v175_v33, %v323_v36  ;;  %v240_v43 = vadd.f32 %v239_v37, %v169_v17  ;;  %v827_v14 = vld [vmem:[%s763_s13 + $0xe0] sm:$0xff]  ;;  %v839_v20 = vld [vmem:[%s763_s13 + $0x188] sm:$0xff]  ;;  %v854_v28 = vld [vmem:[%s763_s13 + $0x1b0] sm:$0xff] }
  0x1d   : > { %v212_v48 = vadd.f32 %v211_v40, %v170_v21  ;;  %v842_v21 = vld [vmem:[%s763_s13 + $0x190] sm:$0xff]  ;;  %v848_v26 = vld [vmem:[%s763_s13 + $0x1a0] sm:$0xff]  ;;  %v851_v27 = vld [vmem:[%s763_s13 + $0x1a8] sm:$0xff] }
  0x1e   : > { %v296_v49 = vmax.f32 %v176_v38, %v295_v41  ;;  %v325_v50 = vmax.f32 %v177_v39, %v324_v42  ;;  %v241_v51 = vadd.f32 %v240_v43, %v171_v22  ;;  %v845_v22 = vld [vmem:[%s763_s13 + $0x198] sm:$0xff]  ;;  %v417_v29 = vadd.f32 %v842_v21, %v824_v13  ;;  %v378_v40 = vld [vmem:[%s763_s13 + $0x1d0] sm:$0xff]  ;;  %v380_v42 = vld [vmem:[%s763_s13 + $0x1e0] sm:$0xff] }
  0x1f   : > { %v213_v54 = vadd.f32 %v212_v48, %v172_v24  ;;  %v859_v31 = vld [vmem:[%s763_s13 + $0x1b8] sm:$0xff]  ;;  %v446_v34 = vadd.f32 %v845_v22, %v839_v20  ;;  %v188_v44 = vld [vmem:[%s763_s13 + $0xf0] sm:$0xff]  ;;  %v404_v5 = vld [vmem:[%s763_s13 + $0x2a0] sm:$0xff] }
  0x20   : > { %v297_v55 = vmax.f32 %v178_v46, %v296_v49  ;;  %v326_v56 = vmax.f32 %v179_v47, %v325_v50  ;;  %v242_v57 = vadd.f32 %v241_v51, %v173_v25  ;;  %v379_v41 = vld [vmem:[%s763_s13 + $0x1d8] sm:$0xff]  ;;  %v418_v43 = vadd.f32 %v417_v29, %v848_v26  ;;  %v381_v50 = vld [vmem:[%s763_s13 + $0x1e8] sm:$0xff] }
  0x21   : > { %v214_v61 = vadd.f32 %v213_v54, %v174_v32  ;;  %v376_v32 = vld [vmem:[%s763_s13 + $0x1c0] sm:$0xff]  ;;  %v189_v45 = vld [vmem:[%s763_s13 + $0xf8] sm:$0xff]  ;;  %v447_v51 = vadd.f32 %v446_v34, %v851_v27  ;;  %v405_v9 = vld [vmem:[%s763_s13 + $0x2a8] sm:$0xff] }
  0x22   : > { %v298_v62 = vmax.f32 %v180_v52, %v297_v55  ;;  %v327_v63 = vmax.f32 %v181_v53, %v326_v56  ;;  %v243_v3 = vadd.f32 %v242_v57, %v175_v33  ;;  %v377_v33 = vld [vmem:[%s763_s13 + $0x1c8] sm:$0xff]  ;;  %v498_v48 = vmax.f32 %v378_v40, %v376_v32  ;;  %v382_v56 = vld [vmem:[%s763_s13 + $0x1f0] sm:$0xff]  ;;  %v383_v57 = vld [vmem:[%s763_s13 + $0x1f8] sm:$0xff] }
  0x23   : > { %v215_v16 = vadd.f32 %v214_v61, %v176_v38  ;;  %v527_v49 = vmax.f32 %v379_v41, %v377_v33  ;;  %v419_v61 = vadd.f32 %v418_v43, %v854_v28 }
  0x24   : > { %v299_v23 = vmax.f32 %v182_v59, %v298_v62  ;;  %v328_v24 = vmax.f32 %v183_v60, %v327_v63  ;;  %v244_v25 = vadd.f32 %v243_v3, %v177_v39  ;;  %v190_v62 = vld [vmem:[%s763_s13 + $0x100] sm:$0xff]  ;;  %v499_v3 = vmax.f32 %v380_v42, %v498_v48 }
  0x25   : > { %v216_v30 = vadd.f32 %v215_v16, %v178_v46  ;;  %v528_v16 = vmax.f32 %v381_v50, %v527_v49  ;;  %v420_v34 = vadd.f32 %v419_v61, %v376_v32 }
  0x26   : > { %v300_v37 = vmax.f32 %v184_v0, %v299_v23  ;;  %v329_v38 = vmax.f32 %v819_v2, %v328_v24  ;;  %v245_v39 = vadd.f32 %v244_v25, %v179_v47  ;;  %v448_v23 = vadd.f32 %v447_v51, %v859_v31  ;;  %v386_v51 = vld [vmem:[%s763_s13 + $0x210] sm:$0xff] }
  0x27   : > { %v217_v46 = vadd.f32 %v216_v30, %v180_v52  ;;  %v191_v52 = vld [vmem:[%s763_s13 + $0x108] sm:$0xff]  ;;  %v500_v43 = vmax.f32 %v382_v56, %v499_v3  ;;  %v529_v36 = vmax.f32 %v383_v57, %v528_v16 }
  0x28   : > { %v301_v54 = vmax.f32 %v827_v14, %v300_v37  ;;  %v330_v47 = vmax.f32 %v830_v15, %v329_v38  ;;  %v246_v55 = vadd.f32 %v245_v39, %v181_v53  ;;  %v384_v53 = vld [vmem:[%s763_s13 + $0x200] sm:$0xff]  ;;  %v385_v30 = vld [vmem:[%s763_s13 + $0x208] sm:$0xff]  ;;  %v192_v37 = vld [vmem:[%s763_s13 + $0x110] sm:$0xff] }
  0x29   : > { %v218_v63 = vadd.f32 %v217_v46, %v182_v59  ;;  %v193_v38 = vld [vmem:[%s763_s13 + $0x118] sm:$0xff]  ;;  %v449_v59 = vadd.f32 %v448_v23, %v377_v33  ;;  %v501_v61 = vmax.f32 %v384_v53, %v500_v43  ;;  %v389_v23 = vld [vmem:[%s763_s13 + $0x228] sm:$0xff]  ;;  %v390_v43 = vld [vmem:[%s763_s13 + $0x230] sm:$0xff] }
  0x2a   : > { %v302_v24 = vmax.f32 %v188_v44, %v301_v54  ;;  %v331_v25 = vmax.f32 %v189_v45, %v330_v47  ;;  %v247_v29 = vadd.f32 %v246_v55, %v183_v60  ;;  %v387_v60 = vld [vmem:[%s763_s13 + $0x218] sm:$0xff]  ;;  %v421_v54 = vadd.f32 %v420_v34, %v378_v40  ;;  %v194_v47 = vld [vmem:[%s763_s13 + $0x120] sm:$0xff]  ;;  %v195_v55 = vld [vmem:[%s763_s13 + $0x128] sm:$0xff] }
  0x2b   : > { %v219_v39 = vadd.f32 %v218_v63, %v184_v0  ;;  %v530_v0 = vmax.f32 %v385_v30, %v529_v36  ;;  %v450_v63 = vadd.f32 %v449_v59, %v379_v41  ;;  %v197_v40 = vld [vmem:[%s763_s13 + $0x138] sm:$0xff]  ;;  %v502_v34 = vmax.f32 %v386_v51, %v501_v61  ;;  %v392_v61 = vld [vmem:[%s763_s13 + $0x240] sm:$0xff] }
  0x2c   : > { %v303_v46 = vmax.f32 %v190_v62, %v302_v24  ;;  %v332_v48 = vmax.f32 %v191_v52, %v331_v25  ;;  %v248_v49 = vadd.f32 %v247_v29, %v819_v2  ;;  %v388_v2 = vld [vmem:[%s763_s13 + $0x220] sm:$0xff]  ;;  %v422_v24 = vadd.f32 %v421_v54, %v380_v42  ;;  %v196_v25 = vld [vmem:[%s763_s13 + $0x130] sm:$0xff] }
  0x2d   : > { %v220_v32 = vadd.f32 %v219_v39, %v827_v14  ;;  %v531_v35 = vmax.f32 %v387_v60, %v530_v0  ;;  %v451_v14 = vadd.f32 %v450_v63, %v381_v50  ;;  %v503_v42 = vmax.f32 %v388_v2, %v502_v34  ;;  %v200_v63 = vld [vmem:[%s763_s13 + $0x150] sm:$0xff] }
  0x2e   : > { %v304_v33 = vmax.f32 %v192_v37, %v303_v46  ;;  %v333_v3 = vmax.f32 %v193_v38, %v332_v48  ;;  %v249_v16 = vadd.f32 %v248_v49, %v830_v15  ;;  %v391_v15 = vld [vmem:[%s763_s13 + $0x238] sm:$0xff]  ;;  %v423_v59 = vadd.f32 %v422_v24, %v382_v56  ;;  %v198_v46 = vld [vmem:[%s763_s13 + $0x140] sm:$0xff]  ;;  %v199_v48 = vld [vmem:[%s763_s13 + $0x148] sm:$0xff] }
  0x2f   : > { %v221_v29 = vadd.f32 %v220_v32, %v188_v44  ;;  %v532_v54 = vmax.f32 %v389_v23, %v531_v35  ;;  %v452_v19 = vadd.f32 %v451_v14, %v383_v57  ;;  %v504_v56 = vmax.f32 %v390_v43, %v503_v42  ;;  %v202_v14 = vld [vmem:[%s763_s13 + $0x160] sm:$0xff]  ;;  %v397_v42 = vld [vmem:[%s763_s13 + $0x268] sm:$0xff] }
  0x30   : > { %v305_v36 = vmax.f32 %v194_v47, %v304_v33  ;;  %v334_v41 = vmax.f32 %v195_v55, %v333_v3  ;;  %v250_v39 = vadd.f32 %v249_v16, %v189_v45  ;;  %v393_v45 = vld [vmem:[%s763_s13 + $0x248] sm:$0xff]  ;;  %v424_v0 = vadd.f32 %v423_v59, %v384_v53  ;;  %v201_v33 = vld [vmem:[%s763_s13 + $0x158] sm:$0xff] }
  0x31   : > { %v222_v49 = vadd.f32 %v221_v29, %v190_v62  ;;  %v533_v16 = vmax.f32 %v391_v15, %v532_v54  ;;  %v453_v24 = vadd.f32 %v452_v19, %v385_v30  ;;  %v394_v29 = vld [vmem:[%s763_s13 + $0x250] sm:$0xff]  ;;  %v505_v53 = vmax.f32 %v392_v61, %v504_v56 }
  0x32   : > { %v306_v44 = vmax.f32 %v196_v25, %v305_v36  ;;  %v335_v50 = vmax.f32 %v197_v40, %v334_v41  ;;  %v251_v32 = vadd.f32 %v250_v39, %v191_v52  ;;  %v395_v52 = vld [vmem:[%s763_s13 + $0x258] sm:$0xff]  ;;  %v425_v34 = vadd.f32 %v424_v0, %v386_v51  ;;  %v203_v36 = vld [vmem:[%s763_s13 + $0x168] sm:$0xff] }
  0x33   : > { %v223_v3 = vadd.f32 %v222_v49, %v192_v37  ;;  %v534_v39 = vmax.f32 %v393_v45, %v533_v16  ;;  %v454_v59 = vadd.f32 %v453_v24, %v387_v60  ;;  %v396_v49 = vld [vmem:[%s763_s13 + $0x260] sm:$0xff]  ;;  %v398_v60 = vld [vmem:[%s763_s13 + $0x270] sm:$0xff]  ;;  %v399_v16 = vld [vmem:[%s763_s13 + $0x278] sm:$0xff] }
  0x34   : > { %v307_v62 = vmax.f32 %v198_v46, %v306_v44  ;;  %v336_v35 = vmax.f32 %v199_v48, %v335_v50  ;;  %v252_v57 = vadd.f32 %v251_v32, %v193_v38  ;;  %v426_v54 = vadd.f32 %v425_v34, %v388_v2  ;;  %v204_v38 = vld [vmem:[%s763_s13 + $0x170] sm:$0xff]  ;;  %v205_v44 = vld [vmem:[%s763_s13 + $0x178] sm:$0xff] }
  0x35   : > { %v224_v41 = vadd.f32 %v223_v3, %v194_v47  ;;  %v506_v32 = vmax.f32 %v394_v29, %v505_v53  ;;  %v535_v51 = vmax.f32 %v395_v52, %v534_v39  ;;  %v455_v0 = vadd.f32 %v454_v59, %v389_v23  ;;  %v401_v53 = vld [vmem:[%s763_s13 + $0x288] sm:$0xff] }
  0x36   : > { %v308_v37 = vmax.f32 %v200_v63, %v307_v62  ;;  %v337_v19 = vmax.f32 %v201_v33, %v336_v35  ;;  %v253_v30 = vadd.f32 %v252_v57, %v195_v55  ;;  %v427_v24 = vadd.f32 %v426_v54, %v390_v43 }
  0x37   : > { %v225_v50 = vadd.f32 %v224_v41, %v196_v25  ;;  %v507_v35 = vmax.f32 %v396_v49, %v506_v32  ;;  %v536_v55 = vmax.f32 %v397_v42, %v535_v51  ;;  %v456_v2 = vadd.f32 %v455_v0, %v391_v15  ;;  %v400_v41 = vld [vmem:[%s763_s13 + $0x280] sm:$0xff]  ;;  %v406_v51 = vld [vmem:[%s763_s13 + $0x2b0] sm:$0xff]  ;;  %v407_v0 = vld [vmem:[%s763_s13 + $0x2b8] sm:$0xff] }
  0x38   : > { %v309_v47 = vmax.f32 %v202_v14, %v308_v37  ;;  %v338_v3 = vmax.f32 %v203_v36, %v337_v19  ;;  %v254_v56 = vadd.f32 %v253_v30, %v197_v40  ;;  %v428_v39 = vadd.f32 %v427_v24, %v392_v61  ;;  %v409_v24 = vld [vmem:[%s763_s13 + $0x2c8] sm:$0xff] }
  0x39   : > { %v226_v62 = vadd.f32 %v225_v50, %v198_v46  ;;  %v508_v23 = vmax.f32 %v398_v60, %v507_v35  ;;  %v537_v59 = vmax.f32 %v399_v16, %v536_v55  ;;  %v457_v40 = vadd.f32 %v456_v2, %v393_v45  ;;  %v402_v46 = vld [vmem:[%s763_s13 + $0x290] sm:$0xff] }
  0x3a   : > { %v310_v57 = vmax.f32 %v204_v38, %v309_v47  ;;  %v339_v34 = vmax.f32 %v205_v44, %v338_v3  ;;  %v255_v25 = vadd.f32 %v254_v56, %v199_v48  ;;  %v403_v48 = vld [vmem:[%s763_s13 + $0x298] sm:$0xff]  ;;  %v429_v19 = vadd.f32 %v428_v39, %v394_v29  ;;  %v408_v56 = vld [vmem:[%s763_s13 + $0x2c0] sm:$0xff] }
  0x3b   : > { %v227_v17 = vadd.f32 %v226_v62, %v200_v63  ;;  %v509_v61 = vmax.f32 %v400_v41, %v508_v23  ;;  %v538_v63 = vmax.f32 %v401_v53, %v537_v59  ;;  %v458_v54 = vadd.f32 %v457_v40, %v395_v52 }
  0x3c   : > { %v256_v37 = vadd.f32 %v255_v25, %v201_v33  ;;  %v311_v43 = vmax.f32 %v290_v10, %v310_v57  ;;  %v340_v15 = vmax.f32 %v319_v18, %v339_v34  ;;  %v994_v45 = vmax.f32 %v772_v6, %v786_v11  ;;  %v410_v34 = vld [vmem:[%s763_s13 + $0x2d0] sm:$0xff]  ;;  %v411_v25 = vld [vmem:[%s763_s13 + $0x2d8] sm:$0xff] }
  0x3d   : > { %v228_v30 = vadd.f32 %v227_v17, %v202_v14  ;;  %v430_v10 = vadd.f32 %v429_v19, %v396_v49  ;;  %v510_v29 = vmax.f32 %v402_v46, %v509_v61  ;;  %v539_v17 = vmax.f32 %v403_v48, %v538_v63  ;;  %v413_v19 = vld [vmem:[%s763_s13 + $0x2e8] sm:$0xff] }
  0x3e   : > { %v257_v50 = vadd.f32 %v256_v37, %v203_v36  ;;  %v312_v33 = vmax.f32 %v994_v45, %v311_v43  ;;  %v341_v8 = vmax.f32 %v995_v4, %v340_v15  ;;  %v459_v14 = vadd.f32 %v458_v54, %v397_v42  ;;  %v412_v15 = vld [vmem:[%s763_s13 + $0x2e0] sm:$0xff]  ;;  %v415_v4 = vld [vmem:[%s763_s13 + $0x2f8] sm:$0xff] }
  0x3f   : > { %v229_v18 = vadd.f32 %v228_v30, %v204_v38  ;;  %v431_v6 = vadd.f32 %v430_v10, %v398_v60  ;;  %v511_v47 = vmax.f32 %v404_v5, %v510_v29  ;;  %v540_v7 = vmax.f32 %v405_v9, %v539_v17 }
  0x40   : > { %v258_v32 = vadd.f32 %v257_v50, %v205_v44  ;;  %v313_v52 = vrot.slane %v312_v33, 4  ;;  %v342_v36 = vrot.slane %v341_v8, 4  ;;  %v460_v12 = vadd.f32 %v459_v14, %v399_v16 }
  0x41   : > { %v230_v11 = vrot.slane %v229_v18, 4  ;;  %v432_v62 = vadd.f32 %v431_v6, %v400_v41  ;;  %v512_v42 = vmax.f32 %v406_v51, %v511_v47  ;;  %v541_v44 = vmax.f32 %v407_v0, %v540_v7 }
  0x42   : > { %v259_v3 = vrot.slane %v258_v32, 4  ;;  %v314_v49 = vmax.f32 %v312_v33, %v313_v52  ;;  %v343_v38 = vmax.f32 %v341_v8, %v342_v36  ;;  %v461_v55 = vadd.f32 %v460_v12, %v401_v53 }
  0x43   : > { %v231_v35 = vadd.f32 %v230_v11, %v229_v18  ;;  %v433_v39 = vadd.f32 %v432_v62, %v402_v46  ;;  %v513_v16 = vmax.f32 %v408_v56, %v512_v42  ;;  %v542_v59 = vmax.f32 %v409_v24, %v541_v44  ;;  %v414_v46 = vld [vmem:[%s763_s13 + $0x2f0] sm:$0xff] }
  0x44   : > { %v260_v2 = vadd.f32 %v259_v3, %v258_v32  ;;  %v315_v60 = vrot.slane %v314_v49, 2  ;;  %v344_v57 = vrot.slane %v343_v38, 2  ;;  %v462_v40 = vadd.f32 %v461_v55, %v403_v48 }
  0x45   : > { %v232_v23 = vrot.slane %v231_v35, 2  ;;  %v434_v30 = vadd.f32 %v433_v39, %v404_v5  ;;  %v514_v53 = vmax.f32 %v410_v34, %v513_v16  ;;  %v543_v63 = vmax.f32 %v411_v25, %v542_v59 }
  0x46   : > { %v261_v37 = vrot.slane %v260_v2, 2  ;;  %v316_v41 = vmax.f32 %v314_v49, %v315_v60  ;;  %v345_v43 = vmax.f32 %v343_v38, %v344_v57  ;;  %v463_v54 = vadd.f32 %v462_v40, %v405_v9 }
  0x47   : > { %v233_v61 = vadd.f32 %v232_v23, %v231_v35  ;;  %v435_v8 = vadd.f32 %v434_v30, %v406_v51  ;;  %v515_v18 = vmax.f32 %v412_v15, %v514_v53  ;;  %v544_v29 = vmax.f32 %v413_v19, %v543_v63 }
  0x48   : > { %v262_v50 = vadd.f32 %v261_v37, %v260_v2  ;;  %v317_v45 = vrot.slane %v316_v41, 1  ;;  %v346_v33 = vrot.slane %v345_v43, 1  ;;  %v464_v48 = vadd.f32 %v463_v54, %v407_v0  ;;  %v206_v2 = vld [vmem:[#allocation2] sm:$0x3] }
  0x49   : > { %v234_v10 = vrot.slane %v233_v61, 1  ;;  %v436_v52 = vadd.f32 %v435_v8, %v408_v56  ;;  %v516_v5 = vmax.f32 %v414_v46, %v515_v18  ;;  %v545_v6 = vmax.f32 %v415_v4, %v544_v29 }
  0x4a   : > { %v263_v17 = vrot.slane %v262_v50, 1  ;;  %v318_v14 = vmax.f32 %v316_v41, %v317_v45  ;;  %v347_v32 = vmax.f32 %v345_v43, %v346_v33  ;;  %v465_v11 = vadd.f32 %v464_v48, %v409_v24  ;;  %v289_v24 = vld [vmem:[#allocation3] sm:$0x3] }
  0x4b   : > { %v235_v36 = vadd.f32 %v234_v10, %v233_v61  ;;  %v437_v7 = vadd.f32 %v436_v52, %v410_v34  ;;  %v525_v12 = vmax.f32 %v839_v20, %v851_v27  ;;  %v996_v51 = vmax.f32 %v824_v13, %v848_v26 }
  0x4c   : > { %v264_v47 = vadd.f32 %v263_v17, %v262_v50  ;;  %v350_v9 = vcombine.low %v318_v14, %v347_v32  ;;  %v466_v3 = vadd.f32 %v465_v11, %v411_v25  ;;  %v526_v0 = vmax.f32 %v845_v22, %v859_v31 }
  0x4d   : > { %v517_v49 = vmax.f32 %v996_v51, %v516_v5  ;;  %v438_v62 = vadd.f32 %v437_v7, %v412_v15  ;;  %v546_v35 = vmax.f32 %v525_v12, %v545_v6  ;;  %v997_v44 = vmax.f32 %v842_v21, %v854_v28 }
  0x4e   : > { %v267_v38 = vcombine.low %v235_v36, %v264_v47  ;;  %v357_v56 = vrot.slane %v350_v9, %v813_v58  ;;  %v467_v42 = vadd.f32 %v466_v3, %v413_v19 }
  0x4f   : > { %v518_v55 = vmax.f32 %v997_v44, %v517_v49  ;;  %v439_v13 = vadd.f32 %v438_v62, %v414_v46  ;;  %v547_v26 = vmax.f32 %v526_v0, %v546_v35 }
  0x50   : > { %v274_v20 = vrot.slane %v267_v38, %v813_v58  ;;  %v364_v27 = vrot.slane %v357_v56, %v813_v58  ;;  %v468_v60 = vadd.f32 %v467_v42, %v415_v4 }
  0x51   : > { %v519_v22 = vrot.slane %v518_v55, 4  ;;  %v440_v34 = vrot.slane %v439_v13, 4  ;;  %v548_v25 = vrot.slane %v547_v26, 4 }
  0x52   : > { %v281_v31 = vrot.slane %v274_v20, %v813_v58  ;;  %v366_v57 = vmax.f32 %v289_v24, %v364_v27  ;;  %v469_v39 = vrot.slane %v468_v60, 4 }
  0x53   : > { %v520_v23 = vmax.f32 %v518_v55, %v519_v22  ;;  %v441_v21 = vadd.f32 %v440_v34, %v439_v13  ;;  %v549_v28 = vmax.f32 %v547_v26, %v548_v25 }
  0x54   : > { %v283_v16 = vadd.f32 %v281_v31, %v206_v2  ;;  %367 = vst.msk [vmem:[#allocation3] sm:$0x3] %vm749_vm0, %v366_v57  ;;  %v470_v59 = vadd.f32 %v469_v39, %v468_v60 }
  0x55   : > { %v521_v40 = vrot.slane %v520_v23, 2  ;;  %v442_v37 = vrot.slane %v441_v21, 2  ;;  %v550_v41 = vrot.slane %v549_v28, 2 }
  0x56   : > { %288 = vst.msk [vmem:[#allocation2] sm:$0x3] %vm749_vm0, %v283_v16  ;;  %v471_v43 = vrot.slane %v470_v59, 2 }
  0x57   : > { %v522_v15 = vmax.f32 %v520_v23, %v521_v40  ;;  %v443_v19 = vadd.f32 %v442_v37, %v441_v21  ;;  %v551_v30 = vmax.f32 %v549_v28, %v550_v41 }
  0x58   : > { %v472_v61 = vadd.f32 %v471_v43, %v470_v59 }
  0x59   : > { %v523_v53 = vrot.slane %v522_v15, 1  ;;  %v444_v63 = vrot.slane %v443_v19, 1  ;;  %v552_v54 = vrot.slane %v551_v30, 1 }
  0x5a   : > { %v473_v50 = vrot.slane %v472_v61, 1 }
  0x5b   : > { %v524_v45 = vmax.f32 %v522_v15, %v523_v53  ;;  %v445_v33 = vadd.f32 %v444_v63, %v443_v19  ;;  %v553_v46 = vmax.f32 %v551_v30, %v552_v54  ;;  %v495_v48 = vld [vmem:[#allocation3] sm:$0x3] }
  0x5c   : > { %v474_v4 = vadd.f32 %v473_v50, %v472_v61 }
  0x5d   : > { %v556_v8 = vcombine.low %v524_v45, %v553_v46  ;;  %v416_v17 = vld [vmem:[#allocation2] sm:$0x3] }
  0x5e   : > { %v477_v10 = vcombine.low %v445_v33, %v474_v4 }
  0x5f   : > { %v563_v18 = vrot.slane %v556_v8, %v813_v58 }
  0x60   : > { %v484_v29 = vrot.slane %v477_v10, %v813_v58 }
  0x61   : > { %v570_v14 = vrot.slane %v563_v18, %v813_v58 }
  0x62   : > { %v491_v32 = vrot.slane %v484_v29, %v813_v58 }
  0x63   : > { %v572_v52 = vmax.f32 %v495_v48, %v570_v14 }
  0x64   : > { %v493_v36 = vadd.f32 %v491_v32, %v416_v17 }
  0x65   : > { %573 = vst.msk [vmem:[#allocation3] sm:$0x3] %vm749_vm0, %v572_v52 }
  0x66   : > { %494 = vst.msk [vmem:[#allocation2] sm:$0x3] %vm749_vm0, %v493_v36 }
  0x6c   : > { %v579_v5 = vld [vmem:[#allocation3] sm:$0x3] }
  0x6d   : > { %v577_v6 = vld [vmem:[#allocation2] sm:$0x3]  ;;  %662 = vst.msk [vmem:[%s147_s17 + $0x1] ss:$2 sm:$0x3] %vm749_vm0, %v579_v5 }
  0x6e   : > { %578 = vst.msk [vmem:[%s147_s17] ss:$2 sm:$0x3] %vm749_vm0, %v577_v6 }
  0x6f PF: > { %s11_s8 = sadd.s32 1, %s716_s8   ;;  %s998_s6 = smov %s712_s7 }
  0x70   : > { %p8_p5 = scmp.ge.s32.totalorder %s11_s8, 4   ;;  %s999_s7 = smov %s1001_s9 }
  0x72   :  { %10 = sbr.rel (!%p8_p5) target bundleno = 2 (0x2), region = 63 }

// kernel: spatial_attention.3
= control target key start
LH: loop header
LB: loop body
LE: loop exit
PB: predicated region body
PF: predicated region fallthrough
CT: control target
= control target key end

     0   :  { %8 = vsyncpa [#allocation3], 0  ;;  %s13969_s0 = inlined_call_operand.vmem [shape: f32[2,2,16,16], index: 0, kind: input, shape index: {}]   ;;  %s13970_s1 = inlined_call_operand.vmem [shape: f32[7,16,16], index: 1, kind: input, shape index: {}]   ;;  %s13971_s2 = inlined_call_operand.vmem [shape: f32[2,7,16,16], index: 2, kind: input, shape index: {}]   ;;  %s13972_s3 = inlined_call_operand.hbm [shape: f32[2,1,16,16], index: 3, kind: output, shape index: {}]  }
   0x1   :  { %10 = vsyncpa [#allocation3 + $0x1], 0  ;;  %s13250_s12 = smov 0   ;;  %s13252_s13 = smov 0  }
   0x2   :  { %s13254_s14 = smov 0   ;;  %s13256_s15 = smov 0  }
   0x3 LB: > { %s13271_s16 = sadd.s32 4294967295, %s13225_s15   ;;  %s10932_s17 = sadd.s32 4294967294, %s13225_s15   ;;  %s13225_s15 = sphi %s13256_s15, %s13978_s15   ;;  %s13221_s14 = sphi %s13254_s14, %s13977_s14   ;;  %s13217_s13 = sphi %s13252_s13, %s13976_s13   ;;  %s13213_s12 = sphi %s13250_s12, %s13975_s12  }
   0x4   : > { %s13275_s18 = sadd.s32 1, %s13225_s15   ;;  %s91_s19 = sadd.s32 1, %s13221_s14 }
   0x5   : > { %s88_s20 = ssub.s32 %s13225_s15, %s13275_s18  ;;  %p101_p0 = scmp.ne.s32.totalorder %s13221_s14, %s13217_s13 }
   0x6   : > { %p89_p1 = scmp.eq.s32.totalorder %s88_s20, 0  ;;  %p102_p2 = scmp.eq.s32.totalorder %s13271_s16, 1 }
   0x7   : > { %p107_p3 = scmp.ne.s32.totalorder %s13217_s13, %s13213_s12  ;;  %p108_p4 = scmp.eq.s32.totalorder %s10932_s17, 1 }
   0x8   : > { %s13286_s21 = scalar_select %p89_p1, %s13221_s14, %s91_s19  }
   0x9   : > { %p13288_p5 = por %p102_p2, %p101_p0  ;;  %p13292_p6 = por %p108_p4, %p107_p3 }
   0xa   : > { %p10935_p7 = scmp.ge.s32.totalorder %s13225_s15, 1  ;;  %p140_p8 = scmp.lt.s32.totalorder %s13225_s15, 3 }
   0xc   : > { %p141_p9 = pnand %p10935_p7, %p140_p8 }
   0xd   : > { %v10941_v0 = vld [vmem:[%s13971_s2 + $0x70] sm:$0xff] (!%p141_p9)  ;;  %v10942_v1 = vld [vmem:[%s13971_s2 + $0x78] sm:$0xff] (!%p141_p9)  ;;  %p164_p10 = scmp.lt.s32.totalorder (!%p141_p9), %s13271_s16, 1  ;;  %vm179_vm0 = vcmask (!%p141_p9), 130048   ;;  %v174_v9 = vld [vmem:[%s13971_s2] sm:$0xff] (!%p141_p9)  ;;  %s161_s20 = sand.u32 (!%p141_p9), 1, %s13217_s13  }
   0xe   : > { %144 = sbr.rel (%p141_p9) target bundleno = 1294 (0x50e), region = 32  ;;  %v187_v2 = vand.u32 (!%p141_p9), 4294901760, %v10941_v0  ;;  %v190_v3 = vand.u32 (!%p141_p9), 4294901760, %v10942_v1  ;;  %v175_v10 = vld [vmem:[%s13971_s2 + $0x8] sm:$0xff] (!%p141_p9)  ;;  %v10945_v21 = vld [vmem:[%s13971_s2 + $0x80] sm:$0xff] (!%p141_p9)  ;;  %v695_v23 = vand.u32 (!%p141_p9), 4294901760, %v174_v9 }
   0xf   : > { %v698_v24 = vand.u32 (!%p141_p9), 4294901760, %v175_v10  ;;  %v10946_v29 = vld [vmem:[%s13971_s2 + $0x88] sm:$0xff] (!%p141_p9)  ;;  %v1205_v30 = vand.u32 (!%p141_p9), 4294901760, %v10945_v21  ;;  %s10936_s24 = sshll.u32 (!%p141_p9), %s161_s20, 4  ;;  %s10987_s25 = sshll.u32 (!%p141_p9), %s13271_s16, 8 }
  0x10   : > { %v13306_v4 = vpack.c.bf16 (!%p141_p9), %v190_v3, %v187_v2  ;;  %v275_v5 = vsub.f32 (!%p141_p9), %v10941_v0, %v187_v2  ;;  %v282_v6 = vsub.f32 (!%p141_p9), %v10942_v1, %v190_v3  ;;  %v1208_v35 = vand.u32 (!%p141_p9), 4294901760, %v10946_v29  ;;  %s163_s26 = scalar_lea.vmem (!%p141_p9), [#allocation2], %s10936_s24  ;;  %s13922_s30 = scalar_lea.hbm (!%p141_p9), %s13972_s3, %s10987_s25 }
  0x11   : > { %v13354_v37 = vsub.f32 (!%p141_p9), %v174_v9, %v695_v23  ;;  %v13356_v38 = vsub.f32 (!%p141_p9), %v175_v10, %v698_v24  ;;  %v13364_v41 = vsub.f32 (!%p141_p9), %v10945_v21, %v1205_v30  ;;  %v13385_v51 = vpack.c.bf16 (!%p141_p9), %v698_v24, %v695_v23  ;;  %s10870_s27 = sshll.u32 (!%p141_p9), %s163_s26, 4  ;;  %s13928_s4 = scalar_lea.sflag (!%p141_p9), [#allocation3], %s161_s20  ;;  %s13924_s27 = int_to_ptr.vmem [resolvable:$true] %s10870_s27 }
  0x12   : > { %12387 = vmatprep.subr.bf16.mxu0 (!%p141_p9), %v13306_v4  ;;  %12375 = vmatprep.subr.bf16.mxu1 (!%p141_p9), %v13306_v4  ;;  %v276_v7 = vand.u32 (!%p141_p9), 4294901760, %v275_v5  ;;  %v283_v8 = vand.u32 (!%p141_p9), 4294901760, %v282_v6  ;;  %v12382_v46 = vpack.c.bf16 (!%p141_p9), %v282_v6, %v275_v5  ;;  %v13378_v49 = vsub.f32 (!%p141_p9), %v10946_v29, %v1208_v35 }
  0x13   : > { %12389 = vmatpush3.bf16.msra.mxu0 (!%p141_p9), %v13306_v4  ;;  %12377 = vmatpush3.bf16.msra.mxu1 (!%p141_p9), %v13306_v4  ;;  %v784_v47 = vand.u32 (!%p141_p9), 4294901760, %v13354_v37  ;;  %v791_v48 = vand.u32 (!%p141_p9), 4294901760, %v13356_v38  ;;  %v1294_v55 = vand.u32 (!%p141_p9), 4294901760, %v13364_v41  ;;  %v13404_v58 = vpack.c.bf16 (!%p141_p9), %v1208_v35, %v1205_v30  ;;  %v10951_v35 = vld [vmem:[%s13971_s2 + $0x90] sm:$0xff] (!%p141_p9) }
  0x14   : > { %v12390_v16 = vpack.c.bf16 (!%p141_p9), %v283_v8, %v276_v7  ;;  %v277_v17 = vsub.f32 (!%p141_p9), %v275_v5, %v276_v7  ;;  %v284_v20 = vsub.f32 (!%p141_p9), %v282_v6, %v283_v8  ;;  %v1301_v56 = vand.u32 (!%p141_p9), 4294901760, %v13378_v49 }
  0x15   : > { %s165_s28 = scalar_select %p164_p10, %s13271_s16, 1  ;;  %v785_v53 = vsub.f32 %v13354_v37, %v784_v47  ;;  %v792_v54 = vsub.f32 %v13356_v38, %v791_v48  ;;  %v1295_v62 = vsub.f32 %v13364_v41, %v1294_v55  ;;  %v12406_v8 = vpack.c.bf16 %v13356_v38, %v13354_v37 }
  0x16   : > { %12391 = vmatprep.subr.bf16.mxu0 %v12390_v16  ;;  %v278_v22 = vand.u32 4294901760, %v277_v17  ;;  %v285_v28 = vand.u32 4294901760, %v284_v20  ;;  %v1302_v63 = vsub.f32 %v13378_v49, %v1301_v56  ;;  %v12430_v9 = vpack.c.bf16 %v13378_v49, %v13364_v41  ;;  %s13163_s16 = scalar_lea.vmem %s13924_s27, 256 }
  0x17   : > { %s10986_s29 = sshll.u32 %s165_s28, 5  ;;  %v786_v60 = vand.u32 4294901760, %v785_v53  ;;  %v793_v61 = vand.u32 4294901760, %v792_v54  ;;  %v1296_v3 = vand.u32 4294901760, %v1295_v62  ;;  %v12414_v10 = vpack.c.bf16 %v791_v48, %v784_v47  ;;  %p13164_p11 = scmp.ne.s32.totalorder %s13924_s27, %s13163_s16 }
  0x18   : > { %s13312_s5 = scalar_lea.vmem %s13969_s0, %s10986_s29  ;;  %v12378_v33 = vpack.c.bf16 %v285_v28, %v278_v22  ;;  %v3234_v37 = vand.u32 4294901760, %v10951_v35 }
  0x19   : > { %v10939_v11 = vld [vmem:[%s13312_s5 + $0x10] sm:$0xff]  ;;  %v10940_v12 = vld [vmem:[%s13312_s5 + $0x18] sm:$0xff]  ;;  %v169_v13 = vld [vmem:[%s13312_s5] sm:$0xff]  ;;  %v12402_v2 = vpack.c.bf16 %v793_v61, %v786_v60  ;;  %p13165_p12 = pnand %p13164_p11, %p13288_p5 }
  0x1a   : > { %v181_v14 = vsel %vm179_vm0, %v10939_v11, 0  ;;  %v184_v15 = vsel %vm179_vm0, %v10940_v12, 0  ;;  %v689_v25 = vsel %vm179_vm0, %v169_v13, 0  ;;  %v170_v36 = vld [vmem:[%s13312_s5 + $0x8] sm:$0xff]  ;;  %12379 = vmatprep.subr.bf16.mxu1 %v12378_v33  ;;  %v12438_v11 = vpack.c.bf16 %v1301_v56, %v1294_v55  ;;  %v10943_v12 = vld [vmem:[%s13971_s2 + $0x10] sm:$0xff]  ;;  %v10944_v13 = vld [vmem:[%s13971_s2 + $0x18] sm:$0xff] }
  0x1b   : > { %v13328_v18 = vand.u32 4294901760, %v181_v14  ;;  %v13330_v19 = vand.u32 4294901760, %v184_v15  ;;  %v13351_v34 = vand.u32 4294901760, %v689_v25  ;;  %v692_v45 = vsel %vm179_vm0, %v170_v36, 0  ;;  %v10952_v36 = vld [vmem:[%s13971_s2 + $0x98] sm:$0xff]  ;;  %v10949_v56 = vld [vmem:[%s13971_s2 + $0x20] sm:$0xff]  ;;  %p13166_p13 = pneg %p13165_p12 }
  0x1c   : > { %v13382_v50 = vand.u32 4294901760, %v692_v45  ;;  %v3237_v38 = vand.u32 4294901760, %v10952_v36  ;;  %s13227_s5 = smov [#allocation2]  }
  0x1d   : > { %v13337_v26 = vsub.f32 %v181_v14, %v13328_v18  ;;  %v13340_v27 = vsub.f32 %v184_v15, %v13330_v19  ;;  %v13372_v44 = vsub.f32 %v689_v25, %v13351_v34  ;;  %v1707_v14 = vand.u32 4294901760, %v10943_v12  ;;  %s13167_s6 = sshll.u32 %s13227_s5, 4  ;;  %s13168_s6 = int_to_ptr.vmem [resolvable:$false] %s13167_s6 }
  0x1e   : > { %v13400_v57 = vsub.f32 %v692_v45, %v13382_v50  ;;  %v1710_v15 = vand.u32 4294901760, %v10944_v13  ;;  %s13169_s7 = scalar_lea.vmem %s13168_s6, 512  ;;  %p13170_p0 = scmp.lt.s32.totalorder %s13924_s27, %s13168_s6 }
  0x1f   : > { %v13346_v31 = vand.u32 4294901760, %v13337_v26  ;;  %v13349_v32 = vand.u32 4294901760, %v13340_v27  ;;  %v13388_v52 = vand.u32 4294901760, %v13372_v44  ;;  %p13171_p1 = scmp.lt.s32.totalorder %s13169_s7, %s13163_s16 }
  0x20   : > { %v13413_v0 = vand.u32 4294901760, %v13400_v57  ;;  %v1802_v17 = vsub.f32 %v10944_v13, %v1710_v15  ;;  %v12446_v24 = vpack.c.bf16 %v1710_v15, %v1707_v14  ;;  %v10958_v13 = vld [vmem:[%s13971_s2 + $0xa8] sm:$0xff] }
  0x21   : > { %11517 = vmatprep.mubr.f32.mxu0 %v13346_v31  ;;  %v256_v39 = vsub.f32 %v13337_v26, %v13346_v31  ;;  %v266_v40 = vsub.f32 %v13340_v27, %v13349_v32  ;;  %v764_v59 = vsub.f32 %v13372_v44, %v13388_v52  ;;  %v4760_v15 = vand.u32 4294901760, %v10958_v13  ;;  %p13172_p2 = por %p13171_p1, %p13170_p0 }
  0x22   : > { %11518 = vmatmul.mubr.f32.vlgmr.msra.gmra.mrb[0].mxu0 %v13349_v32  ;;  %v774_v5 = vsub.f32 %v13400_v57, %v13413_v0  ;;  %v1803_v21 = vand.u32 4294901760, %v1802_v17 }
  0x23   : > { %v13366_v42 = vand.u32 4294901760, %v256_v39  ;;  %v13368_v43 = vand.u32 4294901760, %v266_v40  ;;  %12393 = vmatpush3.bf16.msra.mxu0 %v12390_v16  ;;  %11524 = vmatprep.mubr.f32.mxu0 %v13328_v18  ;;  %v13416_v1 = vand.u32 4294901760, %v764_v59  ;;  %v1795_v16 = vsub.f32 %v10943_v12, %v1707_v14  ;;  %v10957_v12 = vld [vmem:[%s13971_s2 + $0xa0] sm:$0xff]  ;;  %p13173_p3 = pnand %p13172_p2, %p13166_p13 }
  0x24   : > { %12395 = vmatprep.subr.bf16.mxu0 %v13306_v4  ;;  %v13425_v7 = vand.u32 4294901760, %v774_v5  ;;  %v1804_v23 = vsub.f32 %v1802_v17, %v1803_v21  ;;  %v3322_v39 = vsub.f32 %v10951_v35, %v3234_v37  ;;  %v3329_v40 = vsub.f32 %v10952_v36, %v3237_v38 }
  0x25   : > { %11496 = vmatprep.mubr.f32.mxu1 %v13366_v42  ;;  %v1796_v20 = vand.u32 4294901760, %v1795_v16  ;;  %v12454_v30 = vpack.c.bf16 %v1802_v17, %v1795_v16  ;;  %v3736_v59 = vand.u32 4294901760, %v10949_v56  ;;  %v4757_v14 = vand.u32 4294901760, %v10957_v12 }
  0x26   : > { %11497 = vmatmul.mubr.f32.vlgmr.msra.gmra.mrb[0].mxu1 %v13368_v43  ;;  %v1805_v28 = vand.u32 4294901760, %v1804_v23  ;;  %v3323_v41 = vand.u32 4294901760, %v3322_v39  ;;  %v3330_v45 = vand.u32 4294901760, %v3329_v40  ;;  %v12526_v54 = vpack.c.bf16 %v3329_v40, %v3322_v39 }
  0x27   : > { %12381 = vmatpush3.bf16.msra.mxu1 %v12378_v33  ;;  %11503 = vmatprep.mubr.f32.mxu1 %v13328_v18  ;;  %v1797_v22 = vsub.f32 %v1795_v16, %v1796_v20  ;;  %v12462_v33 = vpack.c.bf16 %v1803_v21, %v1796_v20  ;;  %v3824_v61 = vsub.f32 %v10949_v56, %v3736_v59 }
  0x28   : > { %12383 = vmatprep.subr.bf16.mxu1 %v12382_v46  ;;  %v3324_v47 = vsub.f32 %v3322_v39, %v3323_v41  ;;  %v3331_v48 = vsub.f32 %v3329_v40, %v3330_v45  ;;  %v12534_v55 = vpack.c.bf16 %v3330_v45, %v3323_v41  ;;  %v4845_v16 = vsub.f32 %v10957_v12, %v4757_v14  ;;  %v10955_v45 = vld [vmem:[%s13971_s2 + $0x30] sm:$0xff] }
  0x29   : > { %v1798_v25 = vand.u32 4294901760, %v1797_v22  ;;  %v4852_v17 = vsub.f32 %v10958_v13, %v4760_v15  ;;  %v10947_v22 = vld [vmem:[%s13970_s1 + $0x10] sm:$0xff] }
  0x2a   : > { %11525 = vmatmul.mubr.f32.vlgmr.msra.gmra.mrb[0].mxu0 %v13330_v19  ;;  %v3325_v49 = vand.u32 4294901760, %v3324_v47  ;;  %v4846_v20 = vand.u32 4294901760, %v4845_v16  ;;  %v2212_v23 = vsel %vm179_vm0, %v10947_v22, 0  ;;  %v5259_v47 = vand.u32 4294901760, %v10955_v45 }
  0x2b   : > { %12397 = vmatpush3.bf16.msra.mxu0 %v13306_v4  ;;  %11531 = vmatprep.mubr.f32.mxu0 %v13328_v18  ;;  %v1303_v4 = vand.u32 4294901760, %v1302_v63  ;;  %v12450_v29 = vpack.c.bf16 %v1805_v28, %v1798_v25  ;;  %v3825_v63 = vand.u32 4294901760, %v3824_v61  ;;  %v4853_v21 = vand.u32 4294901760, %v4852_v17 }
  0x2c   : > { %12399 = vmatprep.subr.bf16.mxu0 %v13385_v51  ;;  %v4847_v25 = vsub.f32 %v4845_v16, %v4846_v20  ;;  %v12598_v40 = vpack.c.bf16 %v4852_v17, %v4845_v16 }
  0x2d   : > { %v12426_v6 = vpack.c.bf16 %v1303_v4, %v1296_v3  ;;  %v3826_v4 = vsub.f32 %v3824_v61, %v3825_v63  ;;  %v4854_v28 = vsub.f32 %v4852_v17, %v4853_v21  ;;  %v12606_v41 = vpack.c.bf16 %v4853_v21, %v4846_v20 }
  0x2e   : > { %11504 = vmatmul.mubr.f32.vlgmr.msra.gmra.mrb[0].mxu1 %v13330_v19 }
  0x2f   : > { %12385 = vmatpush3.bf16.msra.mxu1 %v12382_v46  ;;  %11510 = vmatprep.mubr.f32.mxu1 %v13337_v26  ;;  %v12518_v46 = vpack.c.bf16 %v3237_v38, %v3234_v37  ;;  %v4855_v35 = vand.u32 4294901760, %v4854_v28 }
  0x30   : > { %12423 = vmatprep.subr.bf16.mxu1 %v13404_v58 }
  0x32   : > { %11532 = vmatmul.mubr.f32.vlgmr.msra.gmra.mrb[0].mxu0 %v13330_v19 }
  0x33   : > { %12401 = vmatpush3.bf16.msra.mxu0 %v13385_v51  ;;  %11538 = vmatprep.mubr.f32.mxu0 %v13416_v1 }
  0x34   : > { %12403 = vmatprep.subr.bf16.mxu0 %v12402_v2 }
  0x36   : > { %11511 = vmatmul.mubr.f32.vlgmr.msra.gmra.mrb[0].mxu1 %v13340_v27 }
  0x37   : > { %12425 = vmatpush3.bf16.msra.mxu1 %v13404_v58  ;;  %11580 = vmatprep.mubr.f32.mxu1 %v13366_v42 }
  0x38   : > { %12427 = vmatprep.subr.bf16.mxu1 %v12426_v6 }
  0x3a   : > { %11539 = vmatmul.mubr.f32.vlgmr.msra.gmra.mrb[0].mxu0 %v13425_v7  ;;  %11581 = vmatmul.mubr.f32.vlgmr.msra.gmra.mrb[2].mxu1 %v13368_v43 }
  0x3b   : > { %12405 = vmatpush3.bf16.msra.mxu0 %v12402_v2  ;;  %12429 = vmatpush3.bf16.msra.mxu1 %v12426_v6  ;;  %v3827_v6 = vand.u32 4294901760, %v3826_v4 }
  0x3c   : > { %11545 = vmatprep.mubr.f32.mxu0 %v13351_v34  ;;  %11587 = vmatprep.mubr.f32.mxu1 %v13328_v18 }
  0x3d   : > { %12407 = vmatprep.subr.bf16.mxu0 %v12406_v8  ;;  %12431 = vmatprep.subr.bf16.mxu1 %v12430_v9 }
  0x42   : > { %11546 = vmatmul.mubr.f32.vlgmr.msra.gmra.mrb[0].mxu0 %v13382_v50  ;;  %11588 = vmatmul.mubr.f32.vlgmr.msra.gmra.mrb[2].mxu1 %v13330_v19 }
  0x43   : > { %12409 = vmatpush3.bf16.msra.mxu0 %v12406_v8  ;;  %12433 = vmatpush3.bf16.msra.mxu1 %v12430_v9 }
  0x44   : > { %11552 = vmatprep.mubr.f32.mxu0 %v13372_v44  ;;  %11594 = vmatprep.mubr.f32.mxu1 %v13337_v26 }
  0x45   : > { %12411 = vmatprep.subr.bf16.mxu0 %v13385_v51  ;;  %12435 = vmatprep.subr.bf16.mxu1 %v13404_v58 }
  0x4a   : > { %11553 = vmatmul.mubr.f32.vlgmr.msra.gmra.mrb[0].mxu0 %v13400_v57  ;;  %11595 = vmatmul.mubr.f32.vlgmr.msra.gmra.mrb[2].mxu1 %v13340_v27 }
  0x4b   : > { %12413 = vmatpush3.bf16.msra.mxu0 %v13385_v51  ;;  %12437 = vmatpush3.bf16.msra.mxu1 %v13404_v58 }
  0x4c   : > { %11559 = vmatprep.mubr.f32.mxu0 %v13388_v52  ;;  %11601 = vmatprep.mubr.f32.mxu1 %v13346_v31 }
  0x4d   : > { %12415 = vmatprep.subr.bf16.mxu0 %v12414_v10  ;;  %12439 = vmatprep.subr.bf16.mxu1 %v12438_v11 }
  0x52   : > { %11560 = vmatmul.mubr.f32.vlgmr.msra.gmra.mrb[0].mxu0 %v13413_v0  ;;  %11602 = vmatmul.mubr.f32.vlgmr.msra.gmra.mrb[2].mxu1 %v13349_v32 }
  0x53   : > { %12417 = vmatpush3.bf16.msra.mxu0 %v12414_v10  ;;  %12441 = vmatpush3.bf16.msra.mxu1 %v12438_v11 }
  0x54   : > { %11566 = vmatprep.mubr.f32.mxu0 %v13351_v34  ;;  %11608 = vmatprep.mubr.f32.mxu1 %v13328_v18 }
  0x55   : > { %12419 = vmatprep.subr.bf16.mxu0 %v13385_v51  ;;  %12443 = vmatprep.subr.bf16.mxu1 %v13404_v58 }
  0x5a   : > { %11567 = vmatmul.mubr.f32.vlgmr.msra.gmra.mrb[0].mxu0 %v13382_v50  ;;  %11609 = vmatmul.mubr.f32.vlgmr.msra.gmra.mrb[2].mxu1 %v13330_v19 }
  0x5b   : > { %12421 = vmatpush3.bf16.msra.mxu0 %v13385_v51  ;;  %12445 = vmatpush3.bf16.msra.mxu1 %v13404_v58  ;;  %v3332_v51 = vand.u32 4294901760, %v3331_v48  ;;  %v10950_v58 = vld [vmem:[%s13971_s2 + $0x28] sm:$0xff] }
  0x5c   : > { %11573 = vmatprep.mubr.f32.mxu0 %v13351_v34  ;;  %11615 = vmatprep.mubr.f32.mxu1 %v13328_v18  ;;  %v3739_v60 = vand.u32 4294901760, %v10950_v58 }
  0x5d   : > { %12447 = vmatprep.subr.bf16.mxu1 %v12446_v24  ;;  %v12522_v53 = vpack.c.bf16 %v3332_v51, %v3325_v49  ;;  %v5347_v49 = vsub.f32 %v10955_v45, %v5259_v47 }
  0x5e   : > { %v3831_v62 = vsub.f32 %v10950_v58, %v3739_v60  ;;  %v12542_v3 = vpack.c.bf16 %v3739_v60, %v3736_v59 }
  0x60   : > { %v3832_v2 = vand.u32 4294901760, %v3831_v62  ;;  %v12550_v10 = vpack.c.bf16 %v3831_v62, %v3824_v61 }
  0x62   : > { %11574 = vmatmul.mubr.f32.vlgmr.msra.gmra.mrb[0].mxu0 %v13382_v50  ;;  %11616 = vmatmul.mubr.f32.vlgmr.msra.gmra.mrb[2].mxu1 %v13330_v19  ;;  %v3833_v5 = vsub.f32 %v3831_v62, %v3832_v2  ;;  %v12558_v11 = vpack.c.bf16 %v3832_v2, %v3825_v63 }
  0x63   : > { %12449 = vmatpush3.bf16.msra.mxu1 %v12446_v24  ;;  %11622 = vmatprep.mubr.f32.mxu1 %v13416_v1 }
  0x64   : > { %12451 = vmatprep.subr.bf16.mxu1 %v12450_v29  ;;  %v3834_v8 = vand.u32 4294901760, %v3833_v5 }
  0x66   : > { %v12546_v9 = vpack.c.bf16 %v3834_v8, %v3827_v6 }
  0x6a   : > { %11623 = vmatmul.mubr.f32.vlgmr.msra.gmra.mrb[2].mxu1 %v13425_v7 }
  0x6b   : > { %12453 = vmatpush3.bf16.msra.mxu1 %v12450_v29  ;;  %11629 = vmatprep.mubr.f32.mxu1 %v13351_v34  ;;  %v13528_v29 = vand.u32 4294901760, %v2212_v23 }
  0x6c   : > { %12455 = vmatprep.subr.bf16.mxu1 %v12454_v30 }
  0x72   : > { %11630 = vmatmul.mubr.f32.vlgmr.msra.gmra.mrb[2].mxu1 %v13382_v50 }
  0x73   : > { %12457 = vmatpush3.bf16.msra.mxu1 %v12454_v30  ;;  %11636 = vmatprep.mubr.f32.mxu1 %v13372_v44  ;;  %v13532_v30 = vsub.f32 %v2212_v23, %v13528_v29 }
  0x74   : > { %12459 = vmatprep.subr.bf16.mxu1 %v12446_v24 }
  0x75   : > { %v2286_v36 = vand.u32 4294901760, %v13532_v30 }
  0x77   : > { %v2287_v37 = vsub.f32 %v13532_v30, %v2286_v36 }
  0x79   : > { %v2288_v39 = vand.u32 4294901760, %v2287_v37 }
  0x7a   : > { %11637 = vmatmul.mubr.f32.vlgmr.msra.gmra.mrb[2].mxu1 %v13400_v57 }
  0x7b   : > { %12461 = vmatpush3.bf16.msra.mxu1 %v12446_v24  ;;  %11643 = vmatprep.mubr.f32.mxu1 %v13388_v52 }
  0x7c   : > { %12463 = vmatprep.subr.bf16.mxu1 %v12462_v33  ;;  %11664 = vmatprep.mubr.f32.mxu0 %v2288_v39 }
  0x82   : > { %11644 = vmatmul.mubr.f32.vlgmr.msra.gmra.mrb[2].mxu1 %v13413_v0 }
  0x83   : > { %12465 = vmatpush3.bf16.msra.mxu1 %v12462_v33  ;;  %11650 = vmatprep.mubr.f32.mxu1 %v13351_v34  ;;  %v4848_v33 = vand.u32 4294901760, %v4847_v25  ;;  %v10948_v25 = vld [vmem:[%s13970_s1 + $0x18] sm:$0xff] }
  0x84   : > { %12467 = vmatprep.subr.bf16.mxu1 %v12446_v24  ;;  %v2215_v28 = vsel %vm179_vm0, %v10948_v25, 0  ;;  %v1197_v25 = vld [vmem:[%s13970_s1 + $0x8] sm:$0xff] }
  0x85   : > { %v12594_v38 = vpack.c.bf16 %v4855_v35, %v4848_v33  ;;  %v13583_v33 = vand.u32 4294901760, %v2215_v28 }
  0x87   : > { %v13586_v35 = vsub.f32 %v2215_v28, %v13583_v33  ;;  %v2723_v28 = vsel %vm179_vm0, %v1197_v25, 0 }
  0x89   : > { %v2296_v37 = vand.u32 4294901760, %v13586_v35 }
  0x8a   : > { %11651 = vmatmul.mubr.f32.vlgmr.msra.gmra.mrb[2].mxu1 %v13382_v50 }
  0x8b   : > { %12469 = vmatpush3.bf16.msra.mxu1 %v12446_v24  ;;  %11657 = vmatprep.mubr.f32.mxu1 %v13351_v34  ;;  %v12590_v24 = vpack.c.bf16 %v4760_v15, %v4757_v14  ;;  %v2297_v45 = vsub.f32 %v13586_v35, %v2296_v37 }
  0x8c   : > { %12519 = vmatprep.subr.bf16.mxu1 %v12518_v46 }
  0x92   : > { %11658 = vmatmul.mubr.f32.vlgmr.msra.gmra.mrb[2].mxu1 %v13382_v50 }
  0x93   : > { %12521 = vmatpush3.bf16.msra.mxu1 %v12518_v46  ;;  %11748 = vmatprep.mubr.f32.mxu1 %v13366_v42 }
  0x94   : > { %12523 = vmatprep.subr.bf16.mxu1 %v12522_v53 }
  0x96   : > { %11749 = vmatmul.mubr.f32.vlgmr.msra.gmra.mrb[4].mxu1 %v13368_v43 }
  0x97   : > { %12525 = vmatpush3.bf16.msra.mxu1 %v12522_v53  ;;  %11755 = vmatprep.mubr.f32.mxu1 %v13328_v18 }
  0x98   : > { %12527 = vmatprep.subr.bf16.mxu1 %v12526_v54 }
  0x9e   : > { %11756 = vmatmul.mubr.f32.vlgmr.msra.gmra.mrb[4].mxu1 %v13330_v19 }
  0x9f   : > { %12529 = vmatpush3.bf16.msra.mxu1 %v12526_v54  ;;  %11762 = vmatprep.mubr.f32.mxu1 %v13337_v26 }
  0xa0   : > { %12531 = vmatprep.subr.bf16.mxu1 %v12518_v46 }
  0xa6   : > { %11763 = vmatmul.mubr.f32.vlgmr.msra.gmra.mrb[4].mxu1 %v13340_v27 }
  0xa7   : > { %12533 = vmatpush3.bf16.msra.mxu1 %v12518_v46  ;;  %11769 = vmatprep.mubr.f32.mxu1 %v13346_v31 }
  0xa8   : > { %12535 = vmatprep.subr.bf16.mxu1 %v12534_v55 }
  0xae   : > { %11770 = vmatmul.mubr.f32.vlgmr.msra.gmra.mrb[4].mxu1 %v13349_v32 }
  0xaf   : > { %12537 = vmatpush3.bf16.msra.mxu1 %v12534_v55  ;;  %11776 = vmatprep.mubr.f32.mxu1 %v13328_v18  ;;  %v5348_v55 = vand.u32 4294901760, %v5347_v49 }
  0xb0   : > { %12539 = vmatprep.subr.bf16.mxu1 %v12518_v46 }
  0xb1   : > { %v5349_v59 = vsub.f32 %v5347_v49, %v5348_v55 }
  0xb3   : > { %v5350_v61 = vand.u32 4294901760, %v5349_v59 }
  0xb6   : > { %11777 = vmatmul.mubr.f32.vlgmr.msra.gmra.mrb[4].mxu1 %v13330_v19 }
  0xb7   : > { %12541 = vmatpush3.bf16.msra.mxu1 %v12518_v46  ;;  %11783 = vmatprep.mubr.f32.mxu1 %v13328_v18  ;;  %v10956_v46 = vld [vmem:[%s13971_s2 + $0x38] sm:$0xff] }
  0xb8   : > { %12543 = vmatprep.subr.bf16.mxu1 %v12542_v3  ;;  %v5262_v48 = vand.u32 4294901760, %v10956_v46 }
  0xba   : > { %v5354_v51 = vsub.f32 %v10956_v46, %v5262_v48  ;;  %v12614_v58 = vpack.c.bf16 %v5262_v48, %v5259_v47 }
  0xbc   : > { %v5355_v56 = vand.u32 4294901760, %v5354_v51  ;;  %v12622_v2 = vpack.c.bf16 %v5354_v51, %v5347_v49 }
  0xbe   : > { %11784 = vmatmul.mubr.f32.vlgmr.msra.gmra.mrb[4].mxu1 %v13330_v19  ;;  %v5356_v60 = vsub.f32 %v5354_v51, %v5355_v56 }
  0xbf   : > { %12545 = vmatpush3.bf16.msra.mxu1 %v12542_v3  ;;  %11790 = vmatprep.mubr.f32.mxu1 %v13416_v1 }
  0xc0   : > { %12547 = vmatprep.subr.bf16.mxu1 %v12546_v9  ;;  %v5357_v62 = vand.u32 4294901760, %v5356_v60 }
  0xc2   : > { %v12618_v63 = vpack.c.bf16 %v5357_v62, %v5350_v61  ;;  %v10969_v61 = vld [vmem:[%s13971_s2 + $0xc0] sm:$0xff]  ;;  %v10970_v62 = vld [vmem:[%s13971_s2 + $0xc8] sm:$0xff] }
  0xc6   : > { %11791 = vmatmul.mubr.f32.vlgmr.msra.gmra.mrb[4].mxu1 %v13425_v7 }
  0xc7   : > { %12549 = vmatpush3.bf16.msra.mxu1 %v12546_v9  ;;  %11797 = vmatprep.mubr.f32.mxu1 %v13351_v34 }
  0xc8   : > { %12551 = vmatprep.subr.bf16.mxu1 %v12550_v10 }
  0xce   : > { %11798 = vmatmul.mubr.f32.vlgmr.msra.gmra.mrb[4].mxu1 %v13382_v50 }
  0xcf   : > { %12553 = vmatpush3.bf16.msra.mxu1 %v12550_v10  ;;  %11804 = vmatprep.mubr.f32.mxu1 %v13372_v44 }
  0xd0   : > { %12555 = vmatprep.subr.bf16.mxu1 %v12542_v3 }
  0xd6   : > { %11805 = vmatmul.mubr.f32.vlgmr.msra.gmra.mrb[4].mxu1 %v13400_v57 }
  0xd7   : > { %12557 = vmatpush3.bf16.msra.mxu1 %v12542_v3  ;;  %11811 = vmatprep.mubr.f32.mxu1 %v13388_v52 }
  0xd8   : > { %12559 = vmatprep.subr.bf16.mxu1 %v12558_v11 }
  0xde   : > { %11812 = vmatmul.mubr.f32.vlgmr.msra.gmra.mrb[4].mxu1 %v13413_v0 }
  0xdf   : > { %12561 = vmatpush3.bf16.msra.mxu1 %v12558_v11  ;;  %11818 = vmatprep.mubr.f32.mxu1 %v13351_v34 }
  0xe0   : > { %12563 = vmatprep.subr.bf16.mxu1 %v12542_v3 }
  0xe6   : > { %11819 = vmatmul.mubr.f32.vlgmr.msra.gmra.mrb[4].mxu1 %v13382_v50 }
  0xe7   : > { %12565 = vmatpush3.bf16.msra.mxu1 %v12542_v3  ;;  %11825 = vmatprep.mubr.f32.mxu1 %v13351_v34  ;;  %v12630_v3 = vpack.c.bf16 %v5355_v56, %v5348_v55 }
  0xe8   : > { %12591 = vmatprep.subr.bf16.mxu1 %v12590_v24 }
  0xee   : > { %11826 = vmatmul.mubr.f32.vlgmr.msra.gmra.mrb[4].mxu1 %v13382_v50 }
  0xef   : > { %12593 = vmatpush3.bf16.msra.mxu1 %v12590_v24  ;;  %11874 = vmatprep.mubr.f32.mxu1 %v13366_v42 }
  0xf0   : > { %12595 = vmatprep.subr.bf16.mxu1 %v12594_v38 }
  0xf2   : > { %11875 = vmatmul.mubr.f32.vlgmr.msra.gmra.mrb[6].mxu1 %v13368_v43 }
  0xf3   : > { %12597 = vmatpush3.bf16.msra.mxu1 %v12594_v38  ;;  %11881 = vmatprep.mubr.f32.mxu1 %v13328_v18 }
  0xf4   : > { %12599 = vmatprep.subr.bf16.mxu1 %v12598_v40 }
  0xfa   : > { %11882 = vmatmul.mubr.f32.vlgmr.msra.gmra.mrb[6].mxu1 %v13330_v19 }
  0xfb   : > { %12601 = vmatpush3.bf16.msra.mxu1 %v12598_v40  ;;  %11888 = vmatprep.mubr.f32.mxu1 %v13337_v26 }
  0xfc   : > { %12603 = vmatprep.subr.bf16.mxu1 %v12590_v24 }
 0x102   : > { %11889 = vmatmul.mubr.f32.vlgmr.msra.gmra.mrb[6].mxu1 %v13340_v27 }
 0x103   : > { %12605 = vmatpush3.bf16.msra.mxu1 %v12590_v24  ;;  %11895 = vmatprep.mubr.f32.mxu1 %v13346_v31 }
 0x104   : > { %12607 = vmatprep.subr.bf16.mxu1 %v12606_v41 }
 0x109   : > { %v11512_v53 = vpop.f32.mrb[0].mxu1 }
 0x10a   : > { %v432_v54 = vpop.f32.mrb[1].mxu1  ;;  %11896 = vmatmul.mubr.f32.vlgmr.msra.gmra.mrb[6].mxu1 %v13349_v32 }
 0x10b   : > { %12609 = vmatpush3.bf16.msra.mxu1 %v12606_v41  ;;  %11902 = vmatprep.mubr.f32.mxu1 %v13328_v18 }
 0x10c   : > { %12611 = vmatprep.subr.bf16.mxu1 %v12590_v24 }
 0x112   : > { %11903 = vmatmul.mubr.f32.vlgmr.msra.gmra.mrb[6].mxu1 %v13330_v19 }
 0x113   : > { %12613 = vmatpush3.bf16.msra.mxu1 %v12590_v24  ;;  %11909 = vmatprep.mubr.f32.mxu1 %v13328_v18 }
 0x114   : > { %12615 = vmatprep.subr.bf16.mxu1 %v12614_v58 }
 0x11a   : > { %11910 = vmatmul.mubr.f32.vlgmr.msra.gmra.mrb[6].mxu1 %v13330_v19 }
 0x11b   : > { %12617 = vmatpush3.bf16.msra.mxu1 %v12614_v58  ;;  %11916 = vmatprep.mubr.f32.mxu1 %v13416_v1 }
 0x11c   : > { %12619 = vmatprep.subr.bf16.mxu1 %v12618_v63 }
 0x122   : > { %11917 = vmatmul.mubr.f32.vlgmr.msra.gmra.mrb[6].mxu1 %v13425_v7 }
 0x123   : > { %12621 = vmatpush3.bf16.msra.mxu1 %v12618_v63  ;;  %11923 = vmatprep.mubr.f32.mxu1 %v13351_v34 }
 0x124   : > { %12623 = vmatprep.subr.bf16.mxu1 %v12622_v2 }
 0x12a   : > { %11924 = vmatmul.mubr.f32.vlgmr.msra.gmra.mrb[6].mxu1 %v13382_v50 }
 0x12b   : > { %12625 = vmatpush3.bf16.msra.mxu1 %v12622_v2  ;;  %11930 = vmatprep.mubr.f32.mxu1 %v13372_v44  ;;  %v7803_v2 = vand.u32 4294901760, %v10969_v61 }
 0x12c   : > { %12627 = vmatprep.subr.bf16.mxu1 %v12614_v58 }
 0x132   : > { %11931 = vmatmul.mubr.f32.vlgmr.msra.gmra.mrb[6].mxu1 %v13400_v57 }
 0x133   : > { %12629 = vmatpush3.bf16.msra.mxu1 %v12614_v58  ;;  %11937 = vmatprep.mubr.f32.mxu1 %v13388_v52 }
 0x134   : > { %12631 = vmatprep.subr.bf16.mxu1 %v12630_v3 }
 0x135   : > { %v11575_v4 = vpop.f32.mrb[0].mxu0 }
 0x136   : > { %v12878_v5 = vadd.f32 %v11575_v4, %v11512_v53  ;;  %v1186_v6 = vpop.f32.mrb[1].mxu0  ;;  %v2298_v53 = vand.u32 4294901760, %v2297_v45 }
 0x137   : > { %v12879_v8 = vadd.f32 %v1186_v6, %v432_v54 }
 0x138   : > { %v2729_v9 = vand.u32 4294901760, %v12878_v5 }
 0x139   : > { %v2726_v10 = vand.u32 4294901760, %v12879_v8 }
 0x13a   : > { %v2821_v11 = vsub.f32 %v12878_v5, %v2729_v9  ;;  %11938 = vmatmul.mubr.f32.vlgmr.msra.gmra.mrb[6].mxu1 %v13413_v0  ;;  %v7891_v5 = vsub.f32 %v10969_v61, %v7803_v2  ;;  %v10953_v61 = vld [vmem:[%s13970_s1 + $0x20] sm:$0xff] }
 0x13b   : > { %v13566_v12 = vpack.c.bf16 %v2729_v9, %v2726_v10  ;;  %v2814_v13 = vsub.f32 %v12879_v8, %v2726_v10  ;;  %12633 = vmatpush3.bf16.msra.mxu1 %v12630_v3  ;;  %11944 = vmatprep.mubr.f32.mxu1 %v13351_v34  ;;  %v7806_v3 = vand.u32 4294901760, %v10970_v62 }
 0x13c   : > { %v2822_v14 = vand.u32 4294901760, %v2821_v11  ;;  %12635 = vmatprep.subr.bf16.mxu1 %v12614_v58  ;;  %v7892_v8 = vand.u32 4294901760, %v7891_v5 }
 0x13d   : > { %v2815_v15 = vand.u32 4294901760, %v2814_v13  ;;  %v13569_v16 = vpack.c.bf16 %v2821_v11, %v2814_v13  ;;  %v13603_v4 = vpack.c.bf16 %v7806_v3, %v7803_v2  ;;  %v7898_v6 = vsub.f32 %v10970_v62, %v7806_v3  ;;  %v10954_v2 = vld [vmem:[%s13970_s1 + $0x28] sm:$0xff] }
 0x13e   : > { %v2823_v17 = vsub.f32 %v2821_v11, %v2822_v14  ;;  %v7893_v10 = vsub.f32 %v7891_v5, %v7892_v8 }
 0x13f   : > { %v2816_v20 = vsub.f32 %v2814_v13, %v2815_v15  ;;  %v13571_v21 = vpack.c.bf16 %v2822_v14, %v2815_v15  ;;  %v7899_v9 = vand.u32 4294901760, %v7898_v6 }
 0x140   : > { %v2824_v22 = vand.u32 4294901760, %v2823_v17  ;;  %v7894_v13 = vand.u32 4294901760, %v7893_v10  ;;  %v12742_v17 = vpack.c.bf16 %v7898_v6, %v7891_v5 }
 0x141   : > { %v2817_v23 = vand.u32 4294901760, %v2816_v20  ;;  %v7900_v11 = vsub.f32 %v7898_v6, %v7899_v9  ;;  %v1196_v20 = vld [vmem:[%s13970_s1] sm:$0xff] }
 0x142   : > { %11945 = vmatmul.mubr.f32.vlgmr.msra.gmra.mrb[6].mxu1 %v13382_v50 }
 0x143   : > { %12637 = vmatpush3.bf16.msra.mxu1 %v12614_v58  ;;  %11951 = vmatprep.mubr.f32.mxu1 %v13351_v34  ;;  %v13575_v24 = vpack.c.bf16 %v2824_v22, %v2817_v23  ;;  %v7901_v14 = vand.u32 4294901760, %v7900_v11  ;;  %v2720_v22 = vsel %vm179_vm0, %v1196_v20, 0 }
 0x144   : > { %12735 = vmatprep.subr.bf16.mxu1 %v13603_v4  ;;  %v13623_v23 = vand.u32 4294901760, %v2720_v22 }
 0x145   : > { %v12738_v15 = vpack.c.bf16 %v7901_v14, %v7894_v13 }
 0x14a   : > { %11952 = vmatmul.mubr.f32.vlgmr.msra.gmra.mrb[6].mxu1 %v13382_v50 }
 0x14b   : > { %12126 = vmatprep.mubr.f32.mxu1 %v13366_v42  ;;  %12737 = vmatpush3.bf16.msra.mxu1 %v13603_v4 }
 0x14c   : > { %12739 = vmatprep.subr.bf16.mxu1 %v12738_v15 }
 0x14e   : > { %12127 = vmatmul.mubr.f32.vlgmr.msra.gmra.mrb[8].mxu1 %v13368_v43 }
 0x14f   : > { %12133 = vmatprep.mubr.f32.mxu1 %v13328_v18  ;;  %12741 = vmatpush3.bf16.msra.mxu1 %v12738_v15 }
 0x150   : > { %12743 = vmatprep.subr.bf16.mxu1 %v12742_v17 }
 0x156   : > { %12134 = vmatmul.mubr.f32.vlgmr.msra.gmra.mrb[8].mxu1 %v13330_v19 }
 0x157   : > { %12745 = vmatpush3.bf16.msra.mxu1 %v12742_v17  ;;  %12140 = vmatprep.mubr.f32.mxu1 %v13337_v26 }
 0x158   : > { %12747 = vmatprep.subr.bf16.mxu1 %v13603_v4 }
 0x15e   : > { %12141 = vmatmul.mubr.f32.vlgmr.msra.gmra.mrb[8].mxu1 %v13340_v27 }
 0x15f   : > { %12749 = vmatpush3.bf16.msra.mxu1 %v13603_v4  ;;  %12147 = vmatprep.mubr.f32.mxu1 %v13346_v31 }
 0x165   : > { %v11659_v38 = vpop.f32.mrb[2].mxu1 }
 0x166   : > { %v2221_v39 = vand.u32 4294901760, %v11659_v38  ;;  %v2198_v40 = vpop.f32.mrb[3].mxu1  ;;  %12148 = vmatmul.mubr.f32.vlgmr.msra.gmra.mrb[8].mxu1 %v13349_v32 }
 0x167   : > { %v2218_v41 = vand.u32 4294901760, %v2198_v40  ;;  %12154 = vmatprep.mubr.f32.mxu1 %v13328_v18 }
 0x168   : > { %v2313_v46 = vsub.f32 %v11659_v38, %v2221_v39  ;;  %v13637_v38 = vand.u32 4294901760, %v2723_v28 }
 0x169   : > { %v13592_v47 = vpack.c.bf16 %v2221_v39, %v2218_v41  ;;  %v2306_v48 = vsub.f32 %v2198_v40, %v2218_v41 }
 0x16a   : > { %v2314_v49 = vand.u32 4294901760, %v2313_v46 }
 0x16b   : > { %v2307_v51 = vand.u32 4294901760, %v2306_v48  ;;  %12471 = vmatprep.subr.bf16.mxu0 %v13592_v47  ;;  %v12478_v54 = vpack.c.bf16 %v2313_v46, %v2306_v48 }
 0x16c   : > { %v2315_v55 = vsub.f32 %v2313_v46, %v2314_v49  ;;  %12473 = vmatpush3.bf16.msra.mxu0 %v13592_v47  ;;  %v10968_v46 = vld [vmem:[%s13971_s2 + $0x58] sm:$0xff] }
 0x16d   : > { %v2308_v56 = vsub.f32 %v2306_v48, %v2307_v51  ;;  %v12486_v58 = vpack.c.bf16 %v2314_v49, %v2307_v51  ;;  %v8308_v48 = vand.u32 4294901760, %v10968_v46 }
 0x16e   : > { %v2316_v59 = vand.u32 4294901760, %v2315_v55 }
 0x16f   : > { %11665 = vmatmul.mubr.f32.vlgmr.msra.gmra.mrb[2].mxu0 %v2298_v53  ;;  %v2309_v60 = vand.u32 4294901760, %v2308_v56  ;;  %v8400_v51 = vsub.f32 %v10968_v46, %v8308_v48 }
 0x170   : > { %11671 = vmatprep.mubr.f32.mxu0 %v13528_v29 }
 0x171   : > { %v12474_v63 = vpack.c.bf16 %v2316_v59, %v2309_v60 }
 0x173   : > { %12475 = vmatprep.subr.bf16.mxu0 %v12474_v63 }
 0x174   : > { %12477 = vmatpush3.bf16.msra.mxu0 %v12474_v63 }
 0x175   : > { %12479 = vmatprep.subr.bf16.mxu0 %v12478_v54 }
 0x177   : > { %11672 = vmatmul.mubr.f32.vlgmr.msra.gmra.mrb[2].mxu0 %v13583_v33 }
 0x178   : > { %12481 = vmatpush3.bf16.msra.mxu0 %v12478_v54  ;;  %11678 = vmatprep.mubr.f32.mxu0 %v13532_v30  ;;  %v12750_v30 = vpack.c.bf16 %v7899_v9, %v7892_v8  ;;  %v8401_v54 = vand.u32 4294901760, %v8400_v51 }
 0x179   : > { %12483 = vmatprep.subr.bf16.mxu0 %v13592_v47 }
 0x17a   : > { %12751 = vmatprep.subr.bf16.mxu1 %v12750_v30  ;;  %v8402_v56 = vsub.f32 %v8400_v51, %v8401_v54 }
 0x17b   : > { %12753 = vmatpush3.bf16.msra.mxu1 %v12750_v30 }
 0x17c   : > { %12755 = vmatprep.subr.bf16.mxu1 %v13603_v4  ;;  %v8403_v59 = vand.u32 4294901760, %v8402_v56 }
 0x17e   : > { %12155 = vmatmul.mubr.f32.vlgmr.msra.gmra.mrb[8].mxu1 %v13330_v19 }
 0x17f   : > { %11679 = vmatmul.mubr.f32.vlgmr.msra.gmra.mrb[2].mxu0 %v13586_v35  ;;  %12757 = vmatpush3.bf16.msra.mxu1 %v13603_v4  ;;  %v4244_v4 = vsel %vm179_vm0, %v10954_v2, 0 }
 0x180   : > { %12485 = vmatpush3.bf16.msra.mxu0 %v13592_v47  ;;  %11685 = vmatprep.mubr.f32.mxu0 %v2286_v36  ;;  %v2793_v36 = vsub.f32 %v2720_v22, %v13623_v23  ;;  %v13699_v5 = vand.u32 4294901760, %v4244_v4 }
 0x181   : > { %12487 = vmatprep.subr.bf16.mxu0 %v12486_v58  ;;  %12161 = vmatprep.mubr.f32.mxu1 %v13328_v18 }
 0x182   : > { %v2794_v35 = vand.u32 4294901760, %v2793_v36 }
 0x184   : > { %v2795_v39 = vsub.f32 %v2793_v36, %v2794_v35 }
 0x186   : > { %v2796_v41 = vand.u32 4294901760, %v2795_v39  ;;  %12162 = vmatmul.mubr.f32.vlgmr.msra.gmra.mrb[8].mxu1 %v13330_v19 }
 0x187   : > { %11686 = vmatmul.mubr.f32.vlgmr.msra.gmra.mrb[2].mxu0 %v2296_v37  ;;  %v13641_v37 = vsub.f32 %v2723_v28, %v13637_v38  ;;  %12168 = vmatprep.mubr.f32.mxu1 %v13416_v1 }
 0x188   : > { %12489 = vmatpush3.bf16.msra.mxu0 %v12486_v58  ;;  %11692 = vmatprep.mubr.f32.mxu0 %v13528_v29 }
 0x189   : > { %12491 = vmatprep.subr.bf16.mxu0 %v13592_v47  ;;  %v2804_v40 = vand.u32 4294901760, %v13641_v37 }
 0x18b   : > { %v2805_v45 = vsub.f32 %v13641_v37, %v2804_v40 }
 0x18f   : > { %11693 = vmatmul.mubr.f32.vlgmr.msra.gmra.mrb[2].mxu0 %v13583_v33 }
 0x190   : > { %12493 = vmatpush3.bf16.msra.mxu0 %v13592_v47  ;;  %11699 = vmatprep.mubr.f32.mxu0 %v13528_v29  ;;  %v2806_v29 = vand.u32 4294901760, %v2805_v45 }
 0x191   : > { %12495 = vmatprep.subr.bf16.mxu0 %v13566_v12 }
 0x197   : > { %11700 = vmatmul.mubr.f32.vlgmr.msra.gmra.mrb[2].mxu0 %v13583_v33  ;;  %v10967_v33 = vld [vmem:[%s13971_s2 + $0x50] sm:$0xff] }
 0x198   : > { %12497 = vmatpush3.bf16.msra.mxu0 %v13566_v12  ;;  %11706 = vmatprep.mubr.f32.mxu0 %v2796_v41  ;;  %v8305_v47 = vand.u32 4294901760, %v10967_v33 }
 0x199   : > { %12499 = vmatprep.subr.bf16.mxu0 %v13575_v24 }
 0x19a   : > { %v13668_v49 = vpack.c.bf16 %v8308_v48, %v8305_v47 }
 0x19c   : > { %12759 = vmatprep.subr.bf16.mxu1 %v13668_v49 }
 0x19d   : > { %12761 = vmatpush3.bf16.msra.mxu1 %v13668_v49 }
 0x19f   : > { %11707 = vmatmul.mubr.f32.vlgmr.msra.gmra.mrb[2].mxu0 %v2806_v29  ;;  %v10976_v29 = vld [vmem:[%s13971_s2 + $0xd8] sm:$0xff] }
 0x1a0   : > { %12501 = vmatpush3.bf16.msra.mxu0 %v13575_v24  ;;  %11713 = vmatprep.mubr.f32.mxu0 %v13623_v23  ;;  %v8393_v24 = vsub.f32 %v10967_v33, %v8305_v47  ;;  %v9329_v46 = vand.u32 4294901760, %v10976_v29 }
 0x1a1   : > { %12503 = vmatprep.subr.bf16.mxu0 %v13569_v16  ;;  %12169 = vmatmul.mubr.f32.vlgmr.msra.gmra.mrb[8].mxu1 %v13425_v7 }
 0x1a2   : > { %v8394_v53 = vand.u32 4294901760, %v8393_v24  ;;  %12175 = vmatprep.mubr.f32.mxu1 %v13351_v34  ;;  %v12766_v62 = vpack.c.bf16 %v8400_v51, %v8393_v24 }
 0x1a4   : > { %v8395_v55 = vsub.f32 %v8393_v24, %v8394_v53  ;;  %v12774_v10 = vpack.c.bf16 %v8401_v54, %v8394_v53 }
 0x1a6   : > { %v8396_v58 = vand.u32 4294901760, %v8395_v55 }
 0x1a7   : > { %11714 = vmatmul.mubr.f32.vlgmr.msra.gmra.mrb[2].mxu0 %v13637_v38 }
 0x1a8   : > { %12505 = vmatpush3.bf16.msra.mxu0 %v13569_v16  ;;  %11720 = vmatprep.mubr.f32.mxu0 %v2793_v36  ;;  %v12762_v60 = vpack.c.bf16 %v8403_v59, %v8396_v58  ;;  %v4241_v16 = vsel %vm179_vm0, %v10953_v61, 0 }
 0x1a9   : > { %12507 = vmatprep.subr.bf16.mxu0 %v13566_v12  ;;  %v13684_v63 = vand.u32 4294901760, %v4241_v16 }
 0x1aa   : > { %12763 = vmatprep.subr.bf16.mxu1 %v12762_v60 }
 0x1ab   : > { %12765 = vmatpush3.bf16.msra.mxu1 %v12762_v60  ;;  %v13695_v3 = vsub.f32 %v4241_v16, %v13684_v63  ;;  %v10959_v60 = vld [vmem:[%s13970_s1 + $0x30] sm:$0xff] }
 0x1ac   : > { %12767 = vmatprep.subr.bf16.mxu1 %v12766_v62  ;;  %v5764_v61 = vsel %vm179_vm0, %v10959_v60, 0  ;;  %v10964_v60 = vld [vmem:[%s13971_s2 + $0xb8] sm:$0xff] }
 0x1ad   : > { %v4315_v6 = vand.u32 4294901760, %v13695_v3  ;;  %v13753_v16 = vand.u32 4294901760, %v5764_v61 }
 0x1ae   : > { %12176 = vmatmul.mubr.f32.vlgmr.msra.gmra.mrb[8].mxu1 %v13382_v50 }
 0x1af   : > { %11721 = vmatmul.mubr.f32.vlgmr.msra.gmra.mrb[2].mxu0 %v13641_v37  ;;  %12769 = vmatpush3.bf16.msra.mxu1 %v12766_v62  ;;  %v4316_v8 = vsub.f32 %v13695_v3, %v4315_v6  ;;  %v13759_v62 = vsub.f32 %v5764_v61, %v13753_v16 }
 0x1b0   : > { %12509 = vmatpush3.bf16.msra.mxu0 %v13566_v12  ;;  %11727 = vmatprep.mubr.f32.mxu0 %v2794_v35 }
 0x1b1   : > { %12511 = vmatprep.subr.bf16.mxu0 %v13571_v21  ;;  %12182 = vmatprep.mubr.f32.mxu1 %v13372_v44  ;;  %v4317_v20 = vand.u32 4294901760, %v4316_v8  ;;  %v5838_v2 = vand.u32 4294901760, %v13759_v62 }
 0x1b2   : > { %12771 = vmatprep.subr.bf16.mxu1 %v13668_v49 }
 0x1b6   : > { %12183 = vmatmul.mubr.f32.vlgmr.msra.gmra.mrb[8].mxu1 %v13400_v57 }
 0x1b7   : > { %11728 = vmatmul.mubr.f32.vlgmr.msra.gmra.mrb[2].mxu0 %v2804_v40  ;;  %12773 = vmatpush3.bf16.msra.mxu1 %v13668_v49 }
 0x1b8   : > { %12513 = vmatpush3.bf16.msra.mxu0 %v13571_v21  ;;  %11734 = vmatprep.mubr.f32.mxu0 %v13623_v23  ;;  %v13707_v21 = vsub.f32 %v4244_v4, %v13699_v5  ;;  %v5839_v4 = vsub.f32 %v13759_v62, %v5838_v2 }
 0x1b9   : > { %12515 = vmatprep.subr.bf16.mxu0 %v13566_v12  ;;  %12189 = vmatprep.mubr.f32.mxu1 %v13388_v52 }
 0x1ba   : > { %v4325_v15 = vand.u32 4294901760, %v13707_v21  ;;  %12775 = vmatprep.subr.bf16.mxu1 %v12774_v10 }
 0x1bc   : > { %v4326_v30 = vsub.f32 %v13707_v21, %v4325_v15 }
 0x1be   : > { %12190 = vmatmul.mubr.f32.vlgmr.msra.gmra.mrb[8].mxu1 %v13413_v0  ;;  %v4327_v40 = vand.u32 4294901760, %v4326_v30 }
 0x1bf   : > { %11735 = vmatmul.mubr.f32.vlgmr.msra.gmra.mrb[2].mxu0 %v13637_v38  ;;  %12777 = vmatpush3.bf16.msra.mxu1 %v12774_v10 }
 0x1c0   : > { %12517 = vmatpush3.bf16.msra.mxu0 %v13566_v12  ;;  %11741 = vmatprep.mubr.f32.mxu0 %v13623_v23 }
 0x1c1   : > { %v11827_v9 = vpop.f32.mrb[4].mxu1  ;;  %12196 = vmatprep.mubr.f32.mxu1 %v13351_v34  ;;  %12779 = vmatprep.subr.bf16.mxu1 %v13668_v49 }
 0x1c2   : > { %v4250_v11 = vand.u32 4294901760, %v11827_v9  ;;  %v4227_v13 = vpop.f32.mrb[5].mxu1 }
 0x1c3   : > { %v4247_v14 = vand.u32 4294901760, %v4227_v13 }
 0x1c4   : > { %v4342_v17 = vsub.f32 %v11827_v9, %v4250_v11 }
 0x1c5   : > { %v13716_v22 = vpack.c.bf16 %v4250_v11, %v4247_v14  ;;  %v4335_v12 = vsub.f32 %v4227_v13, %v4247_v14 }
 0x1c6   : > { %v4343_v23 = vand.u32 4294901760, %v4342_v17  ;;  %12197 = vmatmul.mubr.f32.vlgmr.msra.gmra.mrb[8].mxu1 %v13382_v50 }
 0x1c7   : > { %v4336_v25 = vand.u32 4294901760, %v4335_v12  ;;  %11742 = vmatmul.mubr.f32.vlgmr.msra.gmra.mrb[2].mxu0 %v13637_v38  ;;  %12567 = vmatprep.subr.bf16.mxu0 %v13716_v22  ;;  %v12574_v36 = vpack.c.bf16 %v4342_v17, %v4335_v12  ;;  %v10975_v38 = vld [vmem:[%s13971_s2 + $0xd0] sm:$0xff] }
 0x1c8   : > { %v4344_v28 = vsub.f32 %v4342_v17, %v4343_v23  ;;  %12569 = vmatpush3.bf16.msra.mxu0 %v13716_v22  ;;  %11832 = vmatprep.mubr.f32.mxu0 %v4317_v20  ;;  %v9326_v33 = vand.u32 4294901760, %v10975_v38 }
 0x1c9   : > { %v4337_v35 = vsub.f32 %v4335_v12, %v4336_v25  ;;  %v12582_v37 = vpack.c.bf16 %v4343_v23, %v4336_v25  ;;  %12781 = vmatpush3.bf16.msra.mxu1 %v13668_v49  ;;  %12203 = vmatprep.mubr.f32.mxu1 %v13351_v34  ;;  %v9421_v49 = vsub.f32 %v10976_v29, %v9329_v46  ;;  %v10960_v25 = vld [vmem:[%s13970_s1 + $0x38] sm:$0xff] }
 0x1ca   : > { %v4345_v39 = vand.u32 4294901760, %v4344_v28  ;;  %v12806_v47 = vpack.c.bf16 %v9329_v46, %v9326_v33  ;;  %v9414_v48 = vsub.f32 %v10975_v38, %v9326_v33  ;;  %v5767_v30 = vsel %vm179_vm0, %v10960_v25, 0 }
 0x1cb   : > { %v4338_v41 = vand.u32 4294901760, %v4337_v35  ;;  %v9422_v51 = vand.u32 4294901760, %v9421_v49 }
 0x1cc   : > { %12807 = vmatprep.subr.bf16.mxu1 %v12806_v47  ;;  %v9415_v24 = vand.u32 4294901760, %v9414_v48  ;;  %v12814_v59 = vpack.c.bf16 %v9421_v49, %v9414_v48 }
 0x1cd   : > { %v12570_v45 = vpack.c.bf16 %v4345_v39, %v4338_v41  ;;  %v9423_v54 = vsub.f32 %v9421_v49, %v9422_v51 }
 0x1ce   : > { %12204 = vmatmul.mubr.f32.vlgmr.msra.gmra.mrb[8].mxu1 %v13382_v50  ;;  %v9416_v53 = vsub.f32 %v9414_v48, %v9415_v24 }
 0x1cf   : > { %11833 = vmatmul.mubr.f32.vlgmr.msra.gmra.mrb[2].mxu0 %v4327_v40  ;;  %12571 = vmatprep.subr.bf16.mxu0 %v12570_v45  ;;  %v9424_v56 = vand.u32 4294901760, %v9423_v54 }
 0x1d0   : > { %12573 = vmatpush3.bf16.msra.mxu0 %v12570_v45  ;;  %11839 = vmatprep.mubr.f32.mxu0 %v13684_v63  ;;  %v9417_v55 = vand.u32 4294901760, %v9416_v53 }
 0x1d1   : > { %12575 = vmatprep.subr.bf16.mxu0 %v12574_v36  ;;  %12809 = vmatpush3.bf16.msra.mxu1 %v12806_v47 }
 0x1d2   : > { %12252 = vmatprep.mubr.f32.mxu1 %v13366_v42  ;;  %v12810_v58 = vpack.c.bf16 %v9424_v56, %v9417_v55 }
 0x1d4   : > { %12253 = vmatmul.mubr.f32.vlgmr.msra.gmra.mrb[10].mxu1 %v13368_v43  ;;  %12811 = vmatprep.subr.bf16.mxu1 %v12810_v58 }
 0x1d5   : > { %12259 = vmatprep.mubr.f32.mxu1 %v13328_v18  ;;  %12813 = vmatpush3.bf16.msra.mxu1 %v12810_v58 }
 0x1d6   : > { %12815 = vmatprep.subr.bf16.mxu1 %v12814_v59 }
 0x1d7   : > { %11840 = vmatmul.mubr.f32.vlgmr.msra.gmra.mrb[2].mxu0 %v13699_v5 }
 0x1d8   : > { %12577 = vmatpush3.bf16.msra.mxu0 %v12574_v36  ;;  %11846 = vmatprep.mubr.f32.mxu0 %v13695_v3  ;;  %v12822_v3 = vpack.c.bf16 %v9422_v51, %v9415_v24  ;;  %v13792_v36 = vand.u32 4294901760, %v5767_v30 }
 0x1d9   : > { %12579 = vmatprep.subr.bf16.mxu0 %v13716_v22 }
 0x1da   : > { %v5847_v28 = vsub.f32 %v5767_v30, %v13792_v36 }
 0x1dc   : > { %12260 = vmatmul.mubr.f32.vlgmr.msra.gmra.mrb[10].mxu1 %v13330_v19  ;;  %v5848_v35 = vand.u32 4294901760, %v5847_v28 }
 0x1dd   : > { %12817 = vmatpush3.bf16.msra.mxu1 %v12814_v59  ;;  %12266 = vmatprep.mubr.f32.mxu1 %v13337_v26  ;;  %v10963_v59 = vld [vmem:[%s13971_s2 + $0xb0] sm:$0xff] }
 0x1de   : > { %12819 = vmatprep.subr.bf16.mxu1 %v12806_v47  ;;  %v5849_v38 = vsub.f32 %v5847_v28, %v5848_v35  ;;  %v6280_v61 = vand.u32 4294901760, %v10963_v59 }
 0x1df   : > { %11847 = vmatmul.mubr.f32.vlgmr.msra.gmra.mrb[2].mxu0 %v13707_v21  ;;  %v10974_v21 = vld [vmem:[%s13971_s2 + $0x68] sm:$0xff] }
 0x1e0   : > { %12581 = vmatpush3.bf16.msra.mxu0 %v13716_v22  ;;  %11853 = vmatprep.mubr.f32.mxu0 %v4315_v6  ;;  %v5840_v6 = vand.u32 4294901760, %v5839_v4  ;;  %v9831_v9 = vand.u32 4294901760, %v10974_v21  ;;  %v5850_v49 = vand.u32 4294901760, %v5849_v38  ;;  %v6368_v4 = vsub.f32 %v10963_v59, %v6280_v61 }
 0x1e1   : > { %12583 = vmatprep.subr.bf16.mxu0 %v12582_v37 }
 0x1e2   : > { %v9923_v11 = vsub.f32 %v10974_v21, %v9831_v9 }
 0x1e4   : > { %12267 = vmatmul.mubr.f32.vlgmr.msra.gmra.mrb[10].mxu1 %v13340_v27  ;;  %v9924_v14 = vand.u32 4294901760, %v9923_v11 }
 0x1e5   : > { %12821 = vmatpush3.bf16.msra.mxu1 %v12806_v47  ;;  %12273 = vmatprep.mubr.f32.mxu1 %v13346_v31 }
 0x1e6   : > { %12823 = vmatprep.subr.bf16.mxu1 %v12822_v3  ;;  %v9925_v17 = vsub.f32 %v9923_v11, %v9924_v14 }
 0x1e7   : > { %11854 = vmatmul.mubr.f32.vlgmr.msra.gmra.mrb[2].mxu0 %v4325_v15 }
 0x1e8   : > { %12585 = vmatpush3.bf16.msra.mxu0 %v12582_v37  ;;  %11860 = vmatprep.mubr.f32.mxu0 %v13684_v63 }
 0x1e9   : > { %12587 = vmatprep.subr.bf16.mxu0 %v13716_v22 }
 0x1ec   : > { %12274 = vmatmul.mubr.f32.vlgmr.msra.gmra.mrb[10].mxu1 %v13349_v32 }
 0x1ed   : > { %12825 = vmatpush3.bf16.msra.mxu1 %v12822_v3  ;;  %12280 = vmatprep.mubr.f32.mxu1 %v13328_v18  ;;  %v6283_v3 = vand.u32 4294901760, %v10964_v60 }
 0x1ee   : > { %12827 = vmatprep.subr.bf16.mxu1 %v12806_v47 }
 0x1ef   : > { %11861 = vmatmul.mubr.f32.vlgmr.msra.gmra.mrb[2].mxu0 %v13699_v5 }
 0x1f0   : > { %12589 = vmatpush3.bf16.msra.mxu0 %v13716_v22  ;;  %11867 = vmatprep.mubr.f32.mxu0 %v13684_v63  ;;  %v10973_v63 = vld [vmem:[%s13971_s2 + $0x60] sm:$0xff]  ;;  %v9926_v22 = vand.u32 4294901760, %v9925_v17 }
 0x1f1   : > { %v9828_v8 = vand.u32 4294901760, %v10973_v63 }
 0x1f3   : > { %v12830_v10 = vpack.c.bf16 %v9831_v9, %v9828_v8 }
 0x1f4   : > { %12281 = vmatmul.mubr.f32.vlgmr.msra.gmra.mrb[10].mxu1 %v13330_v19 }
 0x1f5   : > { %12829 = vmatpush3.bf16.msra.mxu1 %v12806_v47  ;;  %12287 = vmatprep.mubr.f32.mxu1 %v13328_v18 }
 0x1f6   : > { %12831 = vmatprep.subr.bf16.mxu1 %v12830_v10 }
 0x1f7   : > { %11868 = vmatmul.mubr.f32.vlgmr.msra.gmra.mrb[2].mxu0 %v13699_v5  ;;  %v9916_v5 = vsub.f32 %v10973_v63, %v9828_v8  ;;  %v6369_v63 = vand.u32 4294901760, %v6368_v4  ;;  %v12662_v8 = vpack.c.bf16 %v6283_v3, %v6280_v61 }
 0x1f8   : > { %11958 = vmatprep.mubr.f32.mxu0 %v5840_v6  ;;  %v6375_v6 = vsub.f32 %v10964_v60, %v6283_v3 }
 0x1f9   : > { %v9917_v13 = vand.u32 4294901760, %v9916_v5  ;;  %v12838_v23 = vpack.c.bf16 %v9923_v11, %v9916_v5  ;;  %v6370_v9 = vsub.f32 %v6368_v4, %v6369_v63 }
 0x1fa   : > { %v6376_v21 = vand.u32 4294901760, %v6375_v6  ;;  %v12670_v11 = vpack.c.bf16 %v6375_v6, %v6368_v4 }
 0x1fb   : > { %v9918_v15 = vsub.f32 %v9916_v5, %v9917_v13  ;;  %v12846_v37 = vpack.c.bf16 %v9924_v14, %v9917_v13  ;;  %v10961_v13 = vld [vmem:[%s13971_s2 + $0x40] sm:$0xff] }
 0x1fc   : > { %12288 = vmatmul.mubr.f32.vlgmr.msra.gmra.mrb[10].mxu1 %v13330_v19 }
 0x1fd   : > { %12833 = vmatpush3.bf16.msra.mxu1 %v12830_v10  ;;  %12294 = vmatprep.mubr.f32.mxu1 %v13416_v1  ;;  %v9919_v20 = vand.u32 4294901760, %v9918_v15 }
 0x1ff   : > { %v12834_v12 = vpack.c.bf16 %v9926_v22, %v9919_v20 }
 0x201   : > { %12835 = vmatprep.subr.bf16.mxu1 %v12834_v12 }
 0x204   : > { %12295 = vmatmul.mubr.f32.vlgmr.msra.gmra.mrb[10].mxu1 %v13425_v7 }
 0x205   : > { %12301 = vmatprep.mubr.f32.mxu1 %v13351_v34  ;;  %12837 = vmatpush3.bf16.msra.mxu1 %v12834_v12 }
 0x206   : > { %12839 = vmatprep.subr.bf16.mxu1 %v12838_v23 }
 0x20c   : > { %12302 = vmatmul.mubr.f32.vlgmr.msra.gmra.mrb[10].mxu1 %v13382_v50 }
 0x20d   : > { %12841 = vmatpush3.bf16.msra.mxu1 %v12838_v23  ;;  %12308 = vmatprep.mubr.f32.mxu1 %v13372_v44 }
 0x20e   : > { %12843 = vmatprep.subr.bf16.mxu1 %v12830_v10 }
 0x214   : > { %12309 = vmatmul.mubr.f32.vlgmr.msra.gmra.mrb[10].mxu1 %v13400_v57 }
 0x215   : > { %12845 = vmatpush3.bf16.msra.mxu1 %v12830_v10  ;;  %12315 = vmatprep.mubr.f32.mxu1 %v13388_v52 }
 0x216   : > { %12847 = vmatprep.subr.bf16.mxu1 %v12846_v37 }
 0x21c   : > { %12316 = vmatmul.mubr.f32.vlgmr.msra.gmra.mrb[10].mxu1 %v13413_v0 }
 0x21d   : > { %v11953_v39 = vpop.f32.mrb[6].mxu1  ;;  %12849 = vmatpush3.bf16.msra.mxu1 %v12846_v37  ;;  %12322 = vmatprep.mubr.f32.mxu1 %v13351_v34 }
 0x21e   : > { %v5773_v40 = vand.u32 4294901760, %v11953_v39  ;;  %v5750_v41 = vpop.f32.mrb[7].mxu1  ;;  %12851 = vmatprep.subr.bf16.mxu1 %v12830_v10 }
 0x21f   : > { %v5770_v45 = vand.u32 4294901760, %v5750_v41 }
 0x220   : > { %v5865_v29 = vsub.f32 %v11953_v39, %v5773_v40 }
 0x221   : > { %v12638_v33 = vpack.c.bf16 %v5773_v40, %v5770_v45  ;;  %v5858_v46 = vsub.f32 %v5750_v41, %v5770_v45  ;;  %v10965_v45 = vld [vmem:[%s13970_s1 + $0x40] sm:$0xff] }
 0x222   : > { %v5866_v47 = vand.u32 4294901760, %v5865_v29 }
 0x223   : > { %v5859_v48 = vand.u32 4294901760, %v5858_v46  ;;  %12639 = vmatprep.subr.bf16.mxu0 %v12638_v33  ;;  %v12646_v24 = vpack.c.bf16 %v5865_v29, %v5858_v46 }
 0x224   : > { %v5867_v51 = vsub.f32 %v5865_v29, %v5866_v47  ;;  %12641 = vmatpush3.bf16.msra.mxu0 %v12638_v33  ;;  %12323 = vmatmul.mubr.f32.vlgmr.msra.gmra.mrb[10].mxu1 %v13382_v50 }
 0x225   : > { %v5860_v53 = vsub.f32 %v5858_v46, %v5859_v48  ;;  %v12654_v54 = vpack.c.bf16 %v5866_v47, %v5859_v48  ;;  %12853 = vmatpush3.bf16.msra.mxu1 %v12830_v10  ;;  %12329 = vmatprep.mubr.f32.mxu1 %v13351_v34  ;;  %v6377_v10 = vsub.f32 %v6375_v6, %v6376_v21 }
 0x226   : > { %v5868_v55 = vand.u32 4294901760, %v5867_v51 }
 0x227   : > { %11959 = vmatmul.mubr.f32.vlgmr.msra.gmra.mrb[2].mxu0 %v5850_v49  ;;  %v5861_v56 = vand.u32 4294901760, %v5860_v53 }
 0x228   : > { %11965 = vmatprep.mubr.f32.mxu0 %v13753_v16 }
 0x229   : > { %v12642_v58 = vpack.c.bf16 %v5868_v55, %v5861_v56 }
 0x22b   : > { %12643 = vmatprep.subr.bf16.mxu0 %v12642_v58 }
 0x22c   : > { %12645 = vmatpush3.bf16.msra.mxu0 %v12642_v58  ;;  %12330 = vmatmul.mubr.f32.vlgmr.msra.gmra.mrb[10].mxu1 %v13382_v50 }
 0x22d   : > { %12647 = vmatprep.subr.bf16.mxu0 %v12646_v24 }
 0x22f   : > { %11966 = vmatmul.mubr.f32.vlgmr.msra.gmra.mrb[2].mxu0 %v13792_v36 }
 0x230   : > { %12649 = vmatpush3.bf16.msra.mxu0 %v12646_v24  ;;  %11972 = vmatprep.mubr.f32.mxu0 %v13759_v62  ;;  %v6371_v62 = vand.u32 4294901760, %v6370_v9 }
 0x231   : > { %12651 = vmatprep.subr.bf16.mxu0 %v12638_v33 }
 0x237   : > { %11973 = vmatmul.mubr.f32.vlgmr.msra.gmra.mrb[2].mxu0 %v5847_v28 }
 0x238   : > { %12653 = vmatpush3.bf16.msra.mxu0 %v12638_v33  ;;  %11979 = vmatprep.mubr.f32.mxu0 %v5838_v2  ;;  %v6378_v2 = vand.u32 4294901760, %v6377_v10 }
 0x239   : > { %12655 = vmatprep.subr.bf16.mxu0 %v12654_v54 }
 0x23a   : > { %v12666_v5 = vpack.c.bf16 %v6378_v2, %v6371_v62 }
 0x23f   : > { %11980 = vmatmul.mubr.f32.vlgmr.msra.gmra.mrb[2].mxu0 %v5848_v35 }
 0x240   : > { %12657 = vmatpush3.bf16.msra.mxu0 %v12654_v54  ;;  %11986 = vmatprep.mubr.f32.mxu0 %v13753_v16 }
 0x241   : > { %12659 = vmatprep.subr.bf16.mxu0 %v12638_v33 }
 0x247   : > { %11987 = vmatmul.mubr.f32.vlgmr.msra.gmra.mrb[2].mxu0 %v13792_v36 }
 0x248   : > { %12661 = vmatpush3.bf16.msra.mxu0 %v12638_v33  ;;  %11993 = vmatprep.mubr.f32.mxu0 %v13753_v16  ;;  %v12678_v16 = vpack.c.bf16 %v6376_v21, %v6369_v63  ;;  %v10966_v21 = vld [vmem:[%s13970_s1 + $0x48] sm:$0xff] }
 0x249   : > { %12663 = vmatprep.subr.bf16.mxu0 %v12662_v8 }
 0x24f   : > { %11994 = vmatmul.mubr.f32.vlgmr.msra.gmra.mrb[2].mxu0 %v13792_v36 }
 0x250   : > { %12665 = vmatpush3.bf16.msra.mxu0 %v12662_v8  ;;  %12000 = vmatprep.mubr.f32.mxu0 %v13366_v42  ;;  %v10962_v42 = vld [vmem:[%s13971_s2 + $0x48] sm:$0xff] }
 0x251   : > { %12667 = vmatprep.subr.bf16.mxu0 %v12666_v5  ;;  %v6785_v14 = vand.u32 4294901760, %v10962_v42 }
 0x253   : > { %12001 = vmatmul.mubr.f32.vlgmr.msra.gmra.mrb[4].mxu0 %v13368_v43  ;;  %v6782_v43 = vand.u32 4294901760, %v10961_v13 }
 0x254   : > { %12669 = vmatpush3.bf16.msra.mxu0 %v12666_v5  ;;  %12007 = vmatprep.mubr.f32.mxu0 %v13328_v18 }
 0x255   : > { %12671 = vmatprep.subr.bf16.mxu0 %v12670_v11  ;;  %v6870_v15 = vsub.f32 %v10961_v13, %v6782_v43  ;;  %v12686_v22 = vpack.c.bf16 %v6785_v14, %v6782_v43 }
 0x257   : > { %v6871_v17 = vand.u32 4294901760, %v6870_v15 }
 0x259   : > { %v6872_v12 = vsub.f32 %v6870_v15, %v6871_v17 }
 0x25b   : > { %12008 = vmatmul.mubr.f32.vlgmr.msra.gmra.mrb[4].mxu0 %v13330_v19 }
 0x25c   : > { %12673 = vmatpush3.bf16.msra.mxu0 %v12670_v11  ;;  %12014 = vmatprep.mubr.f32.mxu0 %v13337_v26  ;;  %v6877_v26 = vsub.f32 %v10962_v42, %v6785_v14 }
 0x25d   : > { %12675 = vmatprep.subr.bf16.mxu0 %v12662_v8 }
 0x25e   : > { %v6878_v20 = vand.u32 4294901760, %v6877_v26 }
 0x260   : > { %v6879_v23 = vsub.f32 %v6877_v26, %v6878_v20 }
 0x263   : > { %12015 = vmatmul.mubr.f32.vlgmr.msra.gmra.mrb[4].mxu0 %v13340_v27  ;;  %v6873_v27 = vand.u32 4294901760, %v6872_v12 }
 0x264   : > { %12677 = vmatpush3.bf16.msra.mxu0 %v12662_v8  ;;  %12021 = vmatprep.mubr.f32.mxu0 %v13346_v31  ;;  %v6880_v31 = vand.u32 4294901760, %v6879_v23 }
 0x265   : > { %12679 = vmatprep.subr.bf16.mxu0 %v12678_v16 }
 0x266   : > { %v12690_v25 = vpack.c.bf16 %v6880_v31, %v6873_v27 }
 0x26b   : > { %12022 = vmatmul.mubr.f32.vlgmr.msra.gmra.mrb[4].mxu0 %v13349_v32  ;;  %v12694_v32 = vpack.c.bf16 %v6877_v26, %v6870_v15 }
 0x26c   : > { %12681 = vmatpush3.bf16.msra.mxu0 %v12678_v16  ;;  %12028 = vmatprep.mubr.f32.mxu0 %v13328_v18 }
 0x26d   : > { %12683 = vmatprep.subr.bf16.mxu0 %v12662_v8 }
 0x273   : > { %12029 = vmatmul.mubr.f32.vlgmr.msra.gmra.mrb[4].mxu0 %v13330_v19 }
 0x274   : > { %12685 = vmatpush3.bf16.msra.mxu0 %v12662_v8  ;;  %12035 = vmatprep.mubr.f32.mxu0 %v13328_v18  ;;  %v12702_v18 = vpack.c.bf16 %v6878_v20, %v6871_v17  ;;  %v7290_v8 = vsel %vm179_vm0, %v10966_v21, 0 }
 0x275   : > { %12687 = vmatprep.subr.bf16.mxu0 %v12686_v22  ;;  %v7369_v9 = vand.u32 4294901760, %v7290_v8 }
 0x277   : > { %v7370_v10 = vsub.f32 %v7290_v8, %v7369_v9 }
 0x279   : > { %v7371_v62 = vand.u32 4294901760, %v7370_v10 }
 0x27b   : > { %12036 = vmatmul.mubr.f32.vlgmr.msra.gmra.mrb[4].mxu0 %v13330_v19  ;;  %v7372_v13 = vsub.f32 %v7370_v10, %v7371_v62 }
 0x27c   : > { %12689 = vmatpush3.bf16.msra.mxu0 %v12686_v22  ;;  %12042 = vmatprep.mubr.f32.mxu0 %v13416_v1 }
 0x27d   : > { %12691 = vmatprep.subr.bf16.mxu0 %v12690_v25  ;;  %v7373_v17 = vand.u32 4294901760, %v7372_v13 }
 0x283   : > { %12043 = vmatmul.mubr.f32.vlgmr.msra.gmra.mrb[4].mxu0 %v13425_v7 }
 0x284   : > { %12693 = vmatpush3.bf16.msra.mxu0 %v12690_v25  ;;  %12049 = vmatprep.mubr.f32.mxu0 %v13351_v34 }
 0x285   : > { %12695 = vmatprep.subr.bf16.mxu0 %v12694_v32 }
 0x28b   : > { %12050 = vmatmul.mubr.f32.vlgmr.msra.gmra.mrb[4].mxu0 %v13382_v50 }
 0x28c   : > { %12697 = vmatpush3.bf16.msra.mxu0 %v12694_v32  ;;  %12056 = vmatprep.mubr.f32.mxu0 %v13372_v44  ;;  %v10971_v32 = vld [vmem:[%s13970_s1 + $0x50] sm:$0xff] }
 0x28d   : > { %12699 = vmatprep.subr.bf16.mxu0 %v12686_v22 }
 0x293   : > { %12057 = vmatmul.mubr.f32.vlgmr.msra.gmra.mrb[4].mxu0 %v13400_v57 }
 0x294   : > { %12701 = vmatpush3.bf16.msra.mxu0 %v12686_v22  ;;  %12063 = vmatprep.mubr.f32.mxu0 %v13388_v52 }
 0x295   : > { %12703 = vmatprep.subr.bf16.mxu0 %v12702_v18 }
 0x29b   : > { %12064 = vmatmul.mubr.f32.vlgmr.msra.gmra.mrb[4].mxu0 %v13413_v0 }
 0x29c   : > { %12705 = vmatpush3.bf16.msra.mxu0 %v12702_v18  ;;  %12070 = vmatprep.mubr.f32.mxu0 %v13351_v34  ;;  %v8810_v18 = vsel %vm179_vm0, %v10971_v32, 0 }
 0x29d   : > { %12707 = vmatprep.subr.bf16.mxu0 %v12686_v22 }
 0x2a1   : > { %v12205_v19 = vpop.f32.mrb[8].mxu1 }
 0x2a2   : > { %v8819_v44 = vand.u32 4294901760, %v12205_v19  ;;  %v8796_v1 = vpop.f32.mrb[9].mxu1 }
 0x2a3   : > { %12071 = vmatmul.mubr.f32.vlgmr.msra.gmra.mrb[4].mxu0 %v13382_v50  ;;  %v8816_v7 = vand.u32 4294901760, %v8796_v1 }
 0x2a4   : > { %12709 = vmatpush3.bf16.msra.mxu0 %v12686_v22  ;;  %12077 = vmatprep.mubr.f32.mxu0 %v13351_v34  ;;  %v8911_v57 = vsub.f32 %v12205_v19, %v8819_v44  ;;  %v8882_v19 = vand.u32 4294901760, %v8810_v18 }
 0x2a5   : > { %v13847_v52 = vpack.c.bf16 %v8819_v44, %v8816_v7  ;;  %v8904_v30 = vsub.f32 %v8796_v1, %v8816_v7  ;;  %v10972_v44 = vld [vmem:[%s13970_s1 + $0x58] sm:$0xff] }
 0x2a6   : > { %v8912_v0 = vand.u32 4294901760, %v8911_v57  ;;  %v8883_v1 = vsub.f32 %v8810_v18, %v8882_v19  ;;  %v8813_v7 = vsel %vm179_vm0, %v10972_v44, 0 }
 0x2a7   : > { %v8905_v36 = vand.u32 4294901760, %v8904_v30  ;;  %v13849_v35 = vpack.c.bf16 %v8911_v57, %v8904_v30 }
 0x2a8   : > { %v8913_v28 = vsub.f32 %v8911_v57, %v8912_v0  ;;  %v8892_v57 = vand.u32 4294901760, %v8813_v7 }
 0x2a9   : > { %v8906_v37 = vsub.f32 %v8904_v30, %v8905_v36  ;;  %v13851_v40 = vpack.c.bf16 %v8912_v0, %v8905_v36  ;;  %v8884_v30 = vand.u32 4294901760, %v8883_v1 }
 0x2aa   : > { %v8914_v39 = vand.u32 4294901760, %v8913_v28  ;;  %v8893_v0 = vsub.f32 %v8813_v7, %v8892_v57 }
 0x2ab   : > { %12078 = vmatmul.mubr.f32.vlgmr.msra.gmra.mrb[4].mxu0 %v13382_v50  ;;  %v8907_v34 = vand.u32 4294901760, %v8906_v37  ;;  %v7287_v50 = vsel %vm179_vm0, %v10965_v45, 0  ;;  %v8885_v36 = vsub.f32 %v8883_v1, %v8884_v30  ;;  %v10977_v45 = vld [vmem:[%s13970_s1 + $0x60] sm:$0xff] }
 0x2ac   : > { %v13859_v38 = vand.u32 4294901760, %v7287_v50  ;;  %v8894_v28 = vand.u32 4294901760, %v8893_v0 }
 0x2ad   : > { %v13853_v41 = vpack.c.bf16 %v8914_v39, %v8907_v34  ;;  %v8886_v37 = vand.u32 4294901760, %v8885_v36 }
 0x2ae   : > { %v7360_v29 = vsub.f32 %v7287_v50, %v13859_v38  ;;  %v8895_v39 = vsub.f32 %v8893_v0, %v8894_v28 }
 0x2b0   : > { %v7361_v33 = vand.u32 4294901760, %v7360_v29  ;;  %v8896_v34 = vand.u32 4294901760, %v8895_v39 }
 0x2b2   : > { %v7362_v47 = vsub.f32 %v7360_v29, %v7361_v33 }
 0x2b4   : > { %v7363_v51 = vand.u32 4294901760, %v7362_v47 }
 0x2b6   : > { %12084 = vmatprep.mubr.f32.mxu0 %v7363_v51 }
 0x2ff   : > { %v12331_v46 = vpop.f32.mrb[10].mxu1 }
 0x300   : > { %v10342_v48 = vand.u32 4294901760, %v12331_v46  ;;  %v10319_v49 = vpop.f32.mrb[11].mxu1 }
 0x301   : > { %v10339_v24 = vand.u32 4294901760, %v10319_v49 }
 0x302   : > { %v10434_v53 = vsub.f32 %v12331_v46, %v10342_v48 }
 0x303   : > { %v13862_v54 = vpack.c.bf16 %v10342_v48, %v10339_v24  ;;  %v10427_v55 = vsub.f32 %v10319_v49, %v10339_v24 }
 0x304   : > { %v10435_v56 = vand.u32 4294901760, %v10434_v53 }
 0x305   : > { %v10428_v58 = vand.u32 4294901760, %v10427_v55  ;;  %v13864_v59 = vpack.c.bf16 %v10434_v53, %v10427_v55 }
 0x306   : > { %v10436_v60 = vsub.f32 %v10434_v53, %v10435_v56 }
 0x307   : > { %v10429_v61 = vsub.f32 %v10427_v55, %v10428_v58  ;;  %v13866_v3 = vpack.c.bf16 %v10435_v56, %v10428_v58 }
 0x308   : > { %v10437_v4 = vand.u32 4294901760, %v10436_v60 }
 0x309   : > { %v10430_v6 = vand.u32 4294901760, %v10429_v61 }
 0x30b   : > { %v13868_v63 = vpack.c.bf16 %v10437_v4, %v10430_v6 }
 0x37e   : > { %v12079_v2 = vpop.f32.mrb[4].mxu0 }
 0x37f   : > { %v7296_v5 = vand.u32 4294901760, %v12079_v2  ;;  %v7273_v11 = vpop.f32.mrb[5].mxu0 }
 0x380   : > { %v7293_v16 = vand.u32 4294901760, %v7273_v11 }
 0x381   : > { %v7388_v42 = vsub.f32 %v12079_v2, %v7296_v5 }
 0x382   : > { %v12710_v43 = vpack.c.bf16 %v7296_v5, %v7293_v16  ;;  %v7381_v14 = vsub.f32 %v7273_v11, %v7293_v16 }
 0x383   : > { %v7389_v15 = vand.u32 4294901760, %v7388_v42 }
 0x384   : > { %v7382_v26 = vand.u32 4294901760, %v7381_v14  ;;  %12711 = vmatprep.subr.bf16.mxu0 %v12710_v43  ;;  %v12718_v20 = vpack.c.bf16 %v7388_v42, %v7381_v14 }
 0x385   : > { %v7390_v22 = vsub.f32 %v7388_v42, %v7389_v15  ;;  %12713 = vmatpush3.bf16.msra.mxu0 %v12710_v43 }
 0x386   : > { %v7383_v12 = vsub.f32 %v7381_v14, %v7382_v26  ;;  %v12726_v23 = vpack.c.bf16 %v7389_v15, %v7382_v26 }
 0x387   : > { %v7391_v27 = vand.u32 4294901760, %v7390_v22 }
 0x388   : > { %12085 = vmatmul.mubr.f32.vlgmr.msra.gmra.mrb[2].mxu0 %v7373_v17  ;;  %v7384_v31 = vand.u32 4294901760, %v7383_v12 }
 0x389   : > { %12091 = vmatprep.mubr.f32.mxu0 %v13859_v38 }
 0x38a   : > { %v12714_v25 = vpack.c.bf16 %v7391_v27, %v7384_v31 }
 0x38c   : > { %12715 = vmatprep.subr.bf16.mxu0 %v12714_v25 }
 0x38d   : > { %12717 = vmatpush3.bf16.msra.mxu0 %v12714_v25 }
 0x38e   : > { %12719 = vmatprep.subr.bf16.mxu0 %v12718_v20 }
 0x390   : > { %12092 = vmatmul.mubr.f32.vlgmr.msra.gmra.mrb[2].mxu0 %v7369_v9 }
 0x391   : > { %12721 = vmatpush3.bf16.msra.mxu0 %v12718_v20  ;;  %12098 = vmatprep.mubr.f32.mxu0 %v7360_v29 }
 0x392   : > { %12723 = vmatprep.subr.bf16.mxu0 %v12710_v43 }
 0x398   : > { %12099 = vmatmul.mubr.f32.vlgmr.msra.gmra.mrb[2].mxu0 %v7370_v10 }
 0x399   : > { %12725 = vmatpush3.bf16.msra.mxu0 %v12710_v43  ;;  %12105 = vmatprep.mubr.f32.mxu0 %v7361_v33 }
 0x39a   : > { %12727 = vmatprep.subr.bf16.mxu0 %v12726_v23 }
 0x3a0   : > { %12106 = vmatmul.mubr.f32.vlgmr.msra.gmra.mrb[2].mxu0 %v7371_v62 }
 0x3a1   : > { %12729 = vmatpush3.bf16.msra.mxu0 %v12726_v23  ;;  %12112 = vmatprep.mubr.f32.mxu0 %v13859_v38 }
 0x3a2   : > { %12731 = vmatprep.subr.bf16.mxu0 %v12710_v43 }
 0x3a8   : > { %12113 = vmatmul.mubr.f32.vlgmr.msra.gmra.mrb[2].mxu0 %v7369_v9 }
 0x3a9   : > { %12733 = vmatpush3.bf16.msra.mxu0 %v12710_v43  ;;  %12119 = vmatprep.mubr.f32.mxu0 %v13859_v38 }
 0x3aa   : > { %12783 = vmatprep.subr.bf16.mxu0 %v13847_v52 }
 0x3b0   : > { %12120 = vmatmul.mubr.f32.vlgmr.msra.gmra.mrb[2].mxu0 %v7369_v9 }
 0x3b1   : > { %12785 = vmatpush3.bf16.msra.mxu0 %v13847_v52  ;;  %12210 = vmatprep.mubr.f32.mxu0 %v8886_v37 }
 0x3b2   : > { %12787 = vmatprep.subr.bf16.mxu0 %v13853_v41 }
 0x3b8   : > { %12211 = vmatmul.mubr.f32.vlgmr.msra.gmra.mrb[2].mxu0 %v8896_v34 }
 0x3b9   : > { %12789 = vmatpush3.bf16.msra.mxu0 %v13853_v41  ;;  %12217 = vmatprep.mubr.f32.mxu0 %v8882_v19  ;;  %v10333_v41 = vsel %vm179_vm0, %v10977_v45, 0 }
 0x3ba   : > { %12791 = vmatprep.subr.bf16.mxu0 %v13849_v35  ;;  %v10405_v50 = vand.u32 4294901760, %v10333_v41 }
 0x3bc   : > { %v10406_v38 = vsub.f32 %v10333_v41, %v10405_v50 }
 0x3be   : > { %v10407_v46 = vand.u32 4294901760, %v10406_v38 }
 0x3c0   : > { %12218 = vmatmul.mubr.f32.vlgmr.msra.gmra.mrb[2].mxu0 %v8892_v57  ;;  %v10408_v48 = vsub.f32 %v10406_v38, %v10407_v46 }
 0x3c1   : > { %12793 = vmatpush3.bf16.msra.mxu0 %v13849_v35  ;;  %12224 = vmatprep.mubr.f32.mxu0 %v8883_v1  ;;  %v10978_v35 = vld [vmem:[%s13970_s1 + $0x68] sm:$0xff] }
 0x3c2   : > { %12795 = vmatprep.subr.bf16.mxu0 %v13847_v52  ;;  %v10336_v29 = vsel %vm179_vm0, %v10978_v35, 0  ;;  %v10409_v24 = vand.u32 4294901760, %v10408_v48 }
 0x3c3   : > { %v10415_v33 = vand.u32 4294901760, %v10336_v29 }
 0x3c5   : > { %v10416_v47 = vsub.f32 %v10336_v29, %v10415_v33 }
 0x3c7   : > { %v10417_v49 = vand.u32 4294901760, %v10416_v47 }
 0x3c8   : > { %12225 = vmatmul.mubr.f32.vlgmr.msra.gmra.mrb[2].mxu0 %v8893_v0 }
 0x3c9   : > { %12797 = vmatpush3.bf16.msra.mxu0 %v13847_v52  ;;  %12231 = vmatprep.mubr.f32.mxu0 %v8884_v30 }
 0x3ca   : > { %12799 = vmatprep.subr.bf16.mxu0 %v13851_v40 }
 0x3d0   : > { %12232 = vmatmul.mubr.f32.vlgmr.msra.gmra.mrb[2].mxu0 %v8894_v28 }
 0x3d1   : > { %12801 = vmatpush3.bf16.msra.mxu0 %v13851_v40  ;;  %12238 = vmatprep.mubr.f32.mxu0 %v8882_v19  ;;  %v10418_v40 = vsub.f32 %v10416_v47, %v10417_v49 }
 0x3d2   : > { %12803 = vmatprep.subr.bf16.mxu0 %v13847_v52 }
 0x3d3   : > { %v10419_v51 = vand.u32 4294901760, %v10418_v40 }
 0x3d8   : > { %12239 = vmatmul.mubr.f32.vlgmr.msra.gmra.mrb[2].mxu0 %v8892_v57 }
 0x3d9   : > { %12805 = vmatpush3.bf16.msra.mxu0 %v13847_v52  ;;  %12245 = vmatprep.mubr.f32.mxu0 %v8882_v19 }
 0x3da   : > { %12855 = vmatprep.subr.bf16.mxu0 %v13862_v54 }
 0x3e0   : > { %12246 = vmatmul.mubr.f32.vlgmr.msra.gmra.mrb[2].mxu0 %v8892_v57 }
 0x3e1   : > { %12857 = vmatpush3.bf16.msra.mxu0 %v13862_v54  ;;  %12336 = vmatprep.mubr.f32.mxu0 %v10409_v24 }
 0x3e2   : > { %12859 = vmatprep.subr.bf16.mxu0 %v13868_v63 }
 0x3e8   : > { %12337 = vmatmul.mubr.f32.vlgmr.msra.gmra.mrb[2].mxu0 %v10419_v51 }
 0x3e9   : > { %12861 = vmatpush3.bf16.msra.mxu0 %v13868_v63  ;;  %12343 = vmatprep.mubr.f32.mxu0 %v10405_v50 }
 0x3ea   : > { %12863 = vmatprep.subr.bf16.mxu0 %v13864_v59 }
 0x3f0   : > { %12344 = vmatmul.mubr.f32.vlgmr.msra.gmra.mrb[2].mxu0 %v10415_v33 }
 0x3f1   : > { %12865 = vmatpush3.bf16.msra.mxu0 %v13864_v59  ;;  %12350 = vmatprep.mubr.f32.mxu0 %v10406_v38 }
 0x3f2   : > { %12867 = vmatprep.subr.bf16.mxu0 %v13862_v54 }
 0x3f8   : > { %12351 = vmatmul.mubr.f32.vlgmr.msra.gmra.mrb[2].mxu0 %v10416_v47 }
 0x3f9   : > { %12869 = vmatpush3.bf16.msra.mxu0 %v13862_v54  ;;  %12357 = vmatprep.mubr.f32.mxu0 %v10407_v46 }
 0x3fa   : > { %12871 = vmatprep.subr.bf16.mxu0 %v13866_v3 }
 0x400   : > { %12358 = vmatmul.mubr.f32.vlgmr.msra.gmra.mrb[2].mxu0 %v10417_v49 }
 0x401   : > { %12873 = vmatpush3.bf16.msra.mxu0 %v13866_v3  ;;  %12364 = vmatprep.mubr.f32.mxu0 %v10405_v50 }
 0x402   : > { %12875 = vmatprep.subr.bf16.mxu0 %v13862_v54 }
 0x408   : > { %12365 = vmatmul.mubr.f32.vlgmr.msra.gmra.mrb[2].mxu0 %v10415_v33 }
 0x409   : > { %12877 = vmatpush3.bf16.msra.mxu0 %v13862_v54  ;;  %12371 = vmatprep.mubr.f32.mxu0 %v10405_v50 }
 0x410   : > { %12372 = vmatmul.mubr.f32.vlgmr.msra.gmra.mrb[2].mxu0 %v10415_v33 }
 0x4e3   : > { %v12373_v52 = vpop.f32.mrb[2].mxu0 }
 0x4e4   : > { %v10980_v53 = vmul.f32 -1.442695, %v12373_v52  ;;  %v10830_v55 = vpop.f32.mrb[3].mxu0 }
 0x4e5   : > { %v10979_v56 = vmul.f32 -1.442695, %v10830_v55 }
 0x4e6   : > { %13155 = vpow2.f32 %v10980_v53 }
 0x4e7   : > { %13157 = vpow2.f32 %v10979_v56 }
 0x4f0   : > { %v13156_v58 = vpop.eup %13155 }
 0x4f1   : > { %v13158_v59 = vpop.eup %13157  ;;  %v10849_v60 = vadd.f32 1.0, %v13156_v58 }
 0x4f2   : > { %v10848_v61 = vadd.f32 1.0, %v13158_v59 }
 0x4f3   : > { %13159 = vrcp.f32 %v10849_v60 }
 0x4f4   : > { %13161 = vrcp.f32 %v10848_v61 }
 0x4fd   : > { %v13160_v54 = vpop.eup %13159 }
 0x4fe   : > { %v13162_v3 = vpop.eup %13161  ;;  %10855 = vst.msk [vmem:[%s163_s26 + $0x8] sm:$0xff] %vm179_vm0, %v13160_v54 }
 0x4ff   : > { %10854 = vst.msk [vmem:[%s163_s26] sm:$0xff] %vm179_vm0, %v13162_v3 }
 0x500   : > { %13176 = shalt.err (!%p13173_p3)
}
 0x501   : > { %s13177_s8 = scalar_lea.hbm %s13922_s30, 256  ;;  %s13181_s11 = scalar_lea.hbm %s13972_s3, 512 }
 0x502   : > { %p13178_p4 = scmp.ne.s32.totalorder %s13922_s30, %s13177_s8  ;;  %p13182_p9 = scmp.lt.u32.totalorder %s13922_s30, %s13972_s3 }
 0x503   : > { %p13183_p10 = scmp.lt.u32.totalorder %s13181_s11, %s13177_s8  ;;  %p13185_p12 = scmp.lt.u32.totalorder %s13177_s8, %s13922_s30 }
 0x504   : > { %p13179_p7 = pnand %p13178_p4, %p13288_p5 }
 0x505   : > { %p13184_p11 = por %p13183_p10, %p13182_p9 }
 0x506   : > { %p13180_p8 = pneg %p13179_p7 }
 0x507   : > { %p13186_p13 = por %p13185_p12, %p13184_p11 }
 0x509   : > { %p13187_p0 = pnand %p13186_p13, %p13180_p8 }
 0x50b   : > { %13190 = shalt.err (!%p13187_p0)
}
 0x50c   : > { %s13228_s20 = smov 128   ;;  %s13229_s24 = smov 8  }
 0x50d   : > { %13114 = dma.vmem_to_hbm [thread:$0]  (%p13288_p5), %s13924_s27, 256, %s13922_s30, %s13928_s4, %s13228_s20, %s13228_s20, %s13229_s24  }
 0x50e PF: > { %p13120_p1 = scmp.ge.s32.totalorder %s13225_s15, 2  ;;  %s10885_s25 = sand.u32 1, %s13213_s12  }
 0x50f   : > { %s10886_s26 = scalar_lea.sflag [#allocation3], %s10885_s25 }
 0x510   : > { %p13117_p2 = pnand %p13120_p1, %p13292_p6 }
 0x512   : > { %13208 = dma.done.wait (!%p13117_p2), %s10886_s26, 256  }
 0x513   : > { %13210 = vsyncadd (!%p13117_p2), %s10886_s26, 4294967040  ;;  %p13_p3 = scmp.ge.s32.totalorder %s13275_s18, 4   ;;  %s13975_s12 = smov %s13217_s13 }
 0x514   : > { %s13976_s13 = smov %s13221_s14  ;;  %s13977_s14 = smov %s13286_s21 }
 0x515   : > { %s13978_s15 = smov %s13275_s18  ;;  %15 = sbr.rel (!%p13_p3) target bundleno = 3 (0x3), region = 87 }
 0x51c   :  { %10891 = vsyncpa [#allocation3], 1 }
 0x51d   :  { %10893 = vsyncpa [#allocation3 + $0x1], 1 }

</bundles_post_ra>
